<compile_context>
chip_gen: v7x
topology: tpu7x:2x2x1
jax: 0.10.0
libtpu: 0.0.40
codegen_flags: <defaults>
</compile_context>

<pallas_src>
import numpy as np
import jax
import jax.numpy as jnp
from jax.experimental import pallas as pl
from jax.experimental.pallas import tpu as pltpu

H_IN, W_IN = 20, 10          # board size implied by Linear(100,.): 9*11*1 + 1 == 100
N_BOARD = H_IN * W_IN        # 200
LINES_SRC = N_BOARD          # lane 200 of the padded input slab carries `lines`

# lane-aligned padded feature widths
P_IN = 256                   # 1*20*10 = 200 -> 256
P1 = 512                     # 3*18*8  = 432 -> 512
P2 = 384                     # 6*14*4  = 336 -> 384
P3 = 128                     # 9*11*1  = 99  -> 128 (lane 99 unused, lines routed to 100/101)
P_OUT = 8                    # q output padded to 8 lanes (only lane 0 real)

# pad lanes carrying (ReLU(lines), ReLU(-lines)) through the conv matmul chain
L1_POS, L1_NEG = 432, 433    # pad region of P1 (valid conv1 feats: 0..431)
L2_POS, L2_NEG = 336, 337    # pad region of P2 (valid conv2 feats: 0..335)
L3_POS, L3_NEG = 100, 101    # pad region of P3 (valid conv3 feats: 0..98)


# ----------------------------- parameter setup ----------------------------- #

def _xavier_uniform(key, shape, fan_in, fan_out):
    bound = float(np.sqrt(6.0 / (fan_in + fan_out)))
    return jax.random.uniform(key, shape, jnp.float32, -bound, bound)


def _conv_to_matrix(w, H, W):
    """Dense Toeplitz matrix for a VALID conv (bias is 0 in this module).

    w: [Cout,Cin,kh,kw] numpy.  Returns M [Cin*H*W, Cout*Ho*Wo], Ho, Wo such
    that flatten(conv(x)) == flatten(x) @ M (PyTorch flatten order)."""
    Cout, Cin, kh, kw = w.shape
    Ho, Wo = H - kh + 1, W - kw + 1
    M = np.zeros((Cin * H * W, Cout * Ho * Wo), dtype=np.float32)
    for co in range(Cout):
        for ho in range(Ho):
            for wo in range(Wo):
                oidx = (co * Ho + ho) * Wo + wo
                for ci in range(Cin):
                    for dh in range(kh):
                        for dw in range(kw):
                            iidx = (ci * H + ho + dh) * W + (wo + dw)
                            M[iidx, oidx] = float(w[co, ci, dh, dw])
    return M, Ho, Wo


def _pad(m, rows, cols):
    m = np.asarray(m, np.float32)
    out = np.zeros((rows, cols), np.float32)
    out[: m.shape[0], : m.shape[1]] = m
    return out


def init_params(key):
    ks = jax.random.split(key, 6)
    # Conv2d weights, PyTorch layout [Cout, Cin, kh, kw]; all biases are 0
    # (nn.init.constant_(m.bias, 0)), so they are dropped from the kernel.
    w1 = _xavier_uniform(ks[0], (3, 1, 3, 3), 1 * 9, 3 * 9)
    w2 = _xavier_uniform(ks[1], (6, 3, 5, 5), 3 * 25, 6 * 25)
    w3 = _xavier_uniform(ks[2], (9, 6, 4, 4), 6 * 16, 9 * 16)
    # Linear weights, PyTorch layout [out, in].
    l1 = _xavier_uniform(ks[3], (100, 100), 100, 100)
    l2 = _xavier_uniform(ks[4], (100, 100), 100, 100)
    l3 = _xavier_uniform(ks[5], (1, 100), 100, 1)

    M1, h1, w1o = _conv_to_matrix(np.asarray(w1), H_IN, W_IN)
    M2, h2, w2o = _conv_to_matrix(np.asarray(w2), h1, w1o)
    M3, h3, w3o = _conv_to_matrix(np.asarray(w3), h2, w2o)
    assert 9 * h3 * w3o == 99, "flattened conv features must be 99 (+1 lines = 100)"

    # Zero-pad to lane-aligned shapes; pad rows/cols are zero so valid lanes
    # are identical to the unpadded network (ReLU(0)==0).
    M1p = _pad(M1, P_IN, P1)                    # [256, 512]
    M2p = _pad(M2, P1, P2)                      # [512, 384]
    M3p = _pad(M3, P2, P3)                      # [384, 128]

    # Route `lines` (board-slab lane 200) through the chain as ReLU(l)/ReLU(-l)
    # living in pad lanes; each +-1/+1 hop is exact in bf16.
    M1p[LINES_SRC, L1_POS] = 1.0
    M1p[LINES_SRC, L1_NEG] = -1.0
    M2p[L1_POS, L2_POS] = 1.0
    M2p[L1_NEG, L2_NEG] = 1.0
    M3p[L2_POS, L3_POS] = 1.0
    M3p[L2_NEG, L3_NEG] = 1.0

    l1T = np.asarray(l1).T                      # [in=100, out=100]
    W1p = _pad(l1T, P3, 128)                    # rows 0..98: conv feats, row 99 sees 0
    W1p[L3_POS, :100] = l1T[99, :]              # + lines weights on ReLU(l)
    W1p[L3_NEG, :100] = -l1T[99, :]             # - lines weights on ReLU(-l)
    W2p = _pad(np.asarray(l2).T, 128, 128)
    W3p = _pad(np.asarray(l3).T, 128, P_OUT)    # lane-narrow q output (col 0 real)

    bf16 = jnp.bfloat16
    kernel_params = tuple(jnp.asarray(m, bf16) for m in (M1p, M2p, M3p, W1p, W2p, W3p))
    raw = dict(conv=(w1, w2, w3), lin=(l1, l2, l3))
    return kernel_params, raw


# --------------------------------- kernel ---------------------------------- #

def _make_kernel(relu_dtype):
    def extended_cnn_kernel(x_ref, m1_ref, m2_ref, m3_ref,
                            w1_ref, w2_ref, w3_ref, out_ref):
        f32, bf16 = jnp.float32, jnp.bfloat16

        def mm_relu(a_bf16, w_ref):
            y = jnp.dot(a_bf16, w_ref[...], preferred_element_type=f32)
            # cast-then-max == max-then-cast here; relu_dtype=bf16 halves VPU
            # work on chips with a bf16 VALU (v6e/v7x).
            return jnp.maximum(y.astype(relu_dtype), 0.0).astype(bf16)

        x = x_ref[...]                       # [TB, 256] bf16 (lane 200 == lines)
        h = mm_relu(x, m1_ref)               # [TB, 512]  conv1 + ReLU
        h = mm_relu(h, m2_ref)               # [TB, 384]  conv2 + ReLU
        f = mm_relu(h, m3_ref)               # [TB, 128]  conv3 + ReLU + Flatten (+lines lanes)
        h = mm_relu(f, w1_ref)               # [TB, 128]  linear1 + ReLU (lines folded in)
        h = mm_relu(h, w2_ref)               # [TB, 128]  linear2 + ReLU
        # linear3 -> lane-narrow [TB, 8] f32 output (only lane 0 meaningful).
        out_ref[...] = jnp.dot(h, w3_ref[...], preferred_element_type=f32)
    return extended_cnn_kernel


# --------------------------------- wrapper ---------------------------------- #

def _round_up(n, m):
    return ((n + m - 1) // m) * m


def _device_kind():
    try:
        return jax.devices()[0].device_kind.lower()
    except Exception:
        return ""


def _cores_per_chip(kind):
    # Megacore chips whose single device spans 2 TensorCores sharded via
    # dimension_semantics=("parallel",).
    return 2 if ("v7" in kind or "v4" in kind) else 1


def _relu_dtype_for(kind):
    # bf16 VALU exists on v6e/v7x; keep f32 elementwise on older chips (v5e etc).
    return jnp.bfloat16 if ("v6" in kind or "v7" in kind) else jnp.float32


def _choose_tile(B, tb_max, cores):
    """Pick (tb, nsteps): tb as large as possible (amortize grid overhead),
    but balanced so mid-size batches don't waste MXU work on pad rows, and the
    step count is a multiple of the TensorCore count on megacore chips."""
    B = max(B, 1)
    b8 = _round_up(B, 8)
    if cores <= 1 and b8 <= tb_max:
        return b8, 1
    nsteps = max(-(-b8 // tb_max), cores)
    nsteps = _round_up(nsteps, cores)
    tb = _round_up(-(-b8 // nsteps), 8)
    return tb, nsteps


def extended_cnn_forward(x, kernel_params, tb_max=2048):
    """x: [B, 1, 20, 10, 2] float32  ->  q: [B, 1] float32.

    tb_max: max batch tile.  2048 fits v7x's 32 MiB scoped-VMEM default; raise
    vmem_limit_bytes before going past it."""
    B = x.shape[0]
    kind = _device_kind()
    cores = _cores_per_chip(kind)
    tb, nsteps = _choose_tile(B, tb_max, cores)
    Bp = tb * nsteps

    # Single bf16 input slab: board (lanes 0..199), lines (lane 200), zero pad.
    board = x[:, 0, :, :, 0].reshape(B, N_BOARD).astype(jnp.float32)       # [B, 200]
    lines = x[:, 0, 0, 0, 1].reshape(B, 1).astype(jnp.float32)             # [B, 1]
    slab = jnp.concatenate([board, lines], axis=1)                         # [B, 201]
    slab = jnp.pad(slab, ((0, Bp - B), (0, P_IN - (N_BOARD + 1)))).astype(jnp.bfloat16)

    m1, m2, m3, w1, w2, w3 = kernel_params

    def wspec(shape):
        # Constant index_map -> weight block is identical every grid step, so
        # it is DMA'd once and stays VMEM-resident across the batch grid.
        return pl.BlockSpec(shape, lambda i: (0, 0))

    out = pl.pallas_call(
        _make_kernel(_relu_dtype_for(kind)),
        out_shape=jax.ShapeDtypeStruct((Bp, P_OUT), jnp.float32),
        grid=(nsteps,),
        in_specs=[
            pl.BlockSpec((tb, P_IN), lambda i: (i, 0)),   # input slab tile (pipelined)
            wspec((P_IN, P1)), wspec((P1, P2)), wspec((P2, P3)),
            wspec((P3, 128)), wspec((128, 128)), wspec((128, P_OUT)),
        ],
        out_specs=pl.BlockSpec((tb, P_OUT), lambda i: (i, 0)),
        compiler_params=pltpu.CompilerParams(
            dimension_semantics=("parallel",),            # megacore sharding on v7x/v4
            # Let XLA fuse the slab slice/concat/pad/cast producer into the
            # pallas_call input stream under jit (avoids an HBM round-trip).
            allow_input_fusion=[True, False, False, False, False, False, False],
        ),
    )(slab, m1, m2, m3, w1, w2, w3)

    return out[:B, :1]


# ------------------------------ pure-JAX ref -------------------------------- #

def reference_forward(x, raw):
    w1, w2, w3 = raw["conv"]
    l1, l2, l3 = raw["lin"]
    h = x[:, :, :, :, 0]
    for w in (w1, w2, w3):
        h = jax.lax.conv_general_dilated(
            h, w, (1, 1), "VALID", dimension_numbers=("NCHW", "OIHW", "NCHW"))
        h = jnp.maximum(h, 0.0)
    feats = h.reshape(h.shape[0], -1)                       # [B, 99], (c, h, w) order
    lines = x[:, 0, 0, 0, 1].reshape(-1, 1)
    f = jnp.concatenate([feats, lines], axis=1)             # [B, 100]
    f = jnp.maximum(f @ l1.T, 0.0)
    f = jnp.maximum(f @ l2.T, 0.0)
    return f @ l3.T


# ---------------------------------- main ------------------------------------ #

if __name__ == "__main__":
    key = jax.random.PRNGKey(0)
    pkey, xkey1, xkey2 = jax.random.split(key, 3)
    kernel_params, raw = init_params(pkey)

    # Small-batch check (single tile, or 2 tiles on megacore chips), under jit
    # so allow_input_fusion can fold the slab prep into the kernel's inputs.
    fwd = jax.jit(lambda xb: extended_cnn_forward(xb, kernel_params))
    B = 2
    x = jax.random.normal(xkey1, (B, 1, H_IN, W_IN, 2), jnp.float32)
    q = jax.block_until_ready(fwd(x))
    assert q.shape == (B, 1) and q.dtype == jnp.float32
    q_ref = jax.block_until_ready(reference_forward(x, raw))
    # bf16 weights/activations (f32 accumulation) -> relaxed tolerance.
    np.testing.assert_allclose(np.asarray(q), np.asarray(q_ref), rtol=5e-2, atol=5e-2)

    # Larger batch with a small tb_max to exercise the multi-step batch grid.
    fwd_grid = jax.jit(lambda xb: extended_cnn_forward(xb, kernel_params, tb_max=128))
    B2 = 300
    x2 = jax.random.normal(xkey2, (B2, 1, H_IN, W_IN, 2), jnp.float32)
    q2 = jax.block_until_ready(fwd_grid(x2))
    q2_ref = jax.block_until_ready(reference_forward(x2, raw))
    assert q2.shape == (B2, 1)
    np.testing.assert_allclose(np.asarray(q2), np.asarray(q2_ref), rtol=5e-2, atol=5e-2)

    print("KERNEL_OK")
</pallas_src>

<mosaic_0001>
module attributes {stable_mosaic.version = 11 : i64} {
  func.func @extended_cnn_kernel(%arg0: i32, %arg1: memref<8x256xbf16, #tpu.memory_space<vmem>>, %arg2: memref<256x512xbf16, #tpu.memory_space<vmem>>, %arg3: memref<512x384xbf16, #tpu.memory_space<vmem>>, %arg4: memref<384x128xbf16, #tpu.memory_space<vmem>>, %arg5: memref<128x128xbf16, #tpu.memory_space<vmem>>, %arg6: memref<128x128xbf16, #tpu.memory_space<vmem>>, %arg7: memref<128x8xbf16, #tpu.memory_space<vmem>>, %arg8: memref<8x8xf32, #tpu.memory_space<vmem>>) attributes {dimension_semantics = [#tpu.dimension_semantics<parallel>], iteration_bounds = array<i64: 1>, scalar_prefetch = 0 : i64, scratch_operands = 0 : i64, tpu.core_type = #tpu.core_type<tc>, window_params = [{transform_indices = @transform_0, window_bounds = array<i64: 8, 256>}, {pipeline_mode = #tpu.pipeline_mode<synchronous>, transform_indices = @transform_1, window_bounds = array<i64: 256, 512>}, {pipeline_mode = #tpu.pipeline_mode<synchronous>, transform_indices = @transform_2, window_bounds = array<i64: 512, 384>}, {pipeline_mode = #tpu.pipeline_mode<synchronous>, transform_indices = @transform_3, window_bounds = array<i64: 384, 128>}, {pipeline_mode = #tpu.pipeline_mode<synchronous>, transform_indices = @transform_4, window_bounds = array<i64: 128, 128>}, {pipeline_mode = #tpu.pipeline_mode<synchronous>, transform_indices = @transform_5, window_bounds = array<i64: 128, 128>}, {pipeline_mode = #tpu.pipeline_mode<synchronous>, transform_indices = @transform_6, window_bounds = array<i64: 128, 8>}, {transform_indices = @transform_7, window_bounds = array<i64: 8, 8>}]} {
    %c0 = arith.constant 0 : index
    %c0_0 = arith.constant 0 : index
    %0 = vector.load %arg1[%c0, %c0_0] : memref<8x256xbf16, #tpu.memory_space<vmem>>, vector<8x256xbf16>
    %c0_1 = arith.constant 0 : index
    %c0_2 = arith.constant 0 : index
    %1 = vector.load %arg2[%c0_1, %c0_2] : memref<256x512xbf16, #tpu.memory_space<vmem>>, vector<256x512xbf16>
    %cst = arith.constant dense<0.000000e+00> : vector<8x512xf32>
    %2 = tpu.matmul %0, %1, %cst {dimension_numbers = #tpu.dot_dimension_numbers<[1], [0], [0], [1], [0, 0, 1, 1], [], []>} : vector<8x256xbf16>, vector<256x512xbf16>, vector<8x512xf32> -> vector<8x512xf32>
    %cst_3 = arith.constant 0.000000e+00 : f32
    %3 = vector.broadcast %cst_3 : f32 to vector<8x512xf32>
    %4 = arith.maximumf %2, %3 : vector<8x512xf32>
    %5 = arith.truncf %4 : vector<8x512xf32> to vector<8x512xbf16>
    %c0_4 = arith.constant 0 : index
    %c0_5 = arith.constant 0 : index
    %6 = vector.load %arg3[%c0_4, %c0_5] : memref<512x384xbf16, #tpu.memory_space<vmem>>, vector<512x384xbf16>
    %cst_6 = arith.constant dense<0.000000e+00> : vector<8x384xf32>
    %7 = tpu.matmul %5, %6, %cst_6 {dimension_numbers = #tpu.dot_dimension_numbers<[1], [0], [0], [1], [0, 0, 1, 1], [], []>} : vector<8x512xbf16>, vector<512x384xbf16>, vector<8x384xf32> -> vector<8x384xf32>
    %cst_7 = arith.constant 0.000000e+00 : f32
    %8 = vector.broadcast %cst_7 : f32 to vector<8x384xf32>
    %9 = arith.maximumf %7, %8 : vector<8x384xf32>
    %10 = arith.truncf %9 : vector<8x384xf32> to vector<8x384xbf16>
    %c0_8 = arith.constant 0 : index
    %c0_9 = arith.constant 0 : index
    %11 = vector.load %arg4[%c0_8, %c0_9] : memref<384x128xbf16, #tpu.memory_space<vmem>>, vector<384x128xbf16>
    %cst_10 = arith.constant dense<0.000000e+00> : vector<8x128xf32>
    %12 = tpu.matmul %10, %11, %cst_10 {dimension_numbers = #tpu.dot_dimension_numbers<[1], [0], [0], [1], [0, 0, 1, 1], [], []>} : vector<8x384xbf16>, vector<384x128xbf16>, vector<8x128xf32> -> vector<8x128xf32>
    %cst_11 = arith.constant 0.000000e+00 : f32
    %13 = vector.broadcast %cst_11 : f32 to vector<8x128xf32>
    %14 = arith.maximumf %12, %13 : vector<8x128xf32>
    %15 = arith.truncf %14 : vector<8x128xf32> to vector<8x128xbf16>
    %c0_12 = arith.constant 0 : index
    %c0_13 = arith.constant 0 : index
    %16 = vector.load %arg5[%c0_12, %c0_13] : memref<128x128xbf16, #tpu.memory_space<vmem>>, vector<128x128xbf16>
    %cst_14 = arith.constant dense<0.000000e+00> : vector<8x128xf32>
    %17 = tpu.matmul %15, %16, %cst_14 {dimension_numbers = #tpu.dot_dimension_numbers<[1], [0], [0], [1], [0, 0, 1, 1], [], []>} : vector<8x128xbf16>, vector<128x128xbf16>, vector<8x128xf32> -> vector<8x128xf32>
    %cst_15 = arith.constant 0.000000e+00 : f32
    %18 = vector.broadcast %cst_15 : f32 to vector<8x128xf32>
    %19 = arith.maximumf %17, %18 : vector<8x128xf32>
    %20 = arith.truncf %19 : vector<8x128xf32> to vector<8x128xbf16>
    %c0_16 = arith.constant 0 : index
    %c0_17 = arith.constant 0 : index
    %21 = vector.load %arg6[%c0_16, %c0_17] : memref<128x128xbf16, #tpu.memory_space<vmem>>, vector<128x128xbf16>
    %cst_18 = arith.constant dense<0.000000e+00> : vector<8x128xf32>
    %22 = tpu.matmul %20, %21, %cst_18 {dimension_numbers = #tpu.dot_dimension_numbers<[1], [0], [0], [1], [0, 0, 1, 1], [], []>} : vector<8x128xbf16>, vector<128x128xbf16>, vector<8x128xf32> -> vector<8x128xf32>
    %cst_19 = arith.constant 0.000000e+00 : f32
    %23 = vector.broadcast %cst_19 : f32 to vector<8x128xf32>
    %24 = arith.maximumf %22, %23 : vector<8x128xf32>
    %25 = arith.truncf %24 : vector<8x128xf32> to vector<8x128xbf16>
    %c0_20 = arith.constant 0 : index
    %c0_21 = arith.constant 0 : index
    %26 = vector.load %arg7[%c0_20, %c0_21] : memref<128x8xbf16, #tpu.memory_space<vmem>>, vector<128x8xbf16>
    %cst_22 = arith.constant dense<0.000000e+00> : vector<8x8xf32>
    %27 = tpu.matmul %25, %26, %cst_22 {dimension_numbers = #tpu.dot_dimension_numbers<[1], [0], [0], [1], [0, 0, 1, 1], [], []>} : vector<8x128xbf16>, vector<128x8xbf16>, vector<8x8xf32> -> vector<8x8xf32>
    %c0_23 = arith.constant 0 : index
    %c0_24 = arith.constant 0 : index
    %28 = vector.load %arg8[%c0_23, %c0_24] : memref<8x8xf32, #tpu.memory_space<vmem>>, vector<8x8xf32>
    tpu.vector_store %arg8[%c0_23, %c0_24], %27 {strides = array<i32>} : memref<8x8xf32, #tpu.memory_space<vmem>>, vector<8x8xf32>,
    return
  }
  func.func @transform_0(%arg0: i32) -> (i32, i32) {
    %c0_i32 = arith.constant 0 : i32
    %c0_i32_0 = arith.constant 0 : i32
    return %arg0, %c0_i32 : i32, i32
  }
  func.func @transform_1(%arg0: i32) -> (i32, i32) {
    %c0_i32 = arith.constant 0 : i32
    %c0_i32_0 = arith.constant 0 : i32
    %c0_i32_1 = arith.constant 0 : i32
    return %c0_i32, %c0_i32_0 : i32, i32
  }
  func.func @transform_2(%arg0: i32) -> (i32, i32) {
    %c0_i32 = arith.constant 0 : i32
    %c0_i32_0 = arith.constant 0 : i32
    %c0_i32_1 = arith.constant 0 : i32
    return %c0_i32, %c0_i32_0 : i32, i32
  }
  func.func @transform_3(%arg0: i32) -> (i32, i32) {
    %c0_i32 = arith.constant 0 : i32
    %c0_i32_0 = arith.constant 0 : i32
    %c0_i32_1 = arith.constant 0 : i32
    return %c0_i32, %c0_i32_0 : i32, i32
  }
  func.func @transform_4(%arg0: i32) -> (i32, i32) {
    %c0_i32 = arith.constant 0 : i32
    %c0_i32_0 = arith.constant 0 : i32
    %c0_i32_1 = arith.constant 0 : i32
    return %c0_i32, %c0_i32_0 : i32, i32
  }
  func.func @transform_5(%arg0: i32) -> (i32, i32) {
    %c0_i32 = arith.constant 0 : i32
    %c0_i32_0 = arith.constant 0 : i32
    %c0_i32_1 = arith.constant 0 : i32
    return %c0_i32, %c0_i32_0 : i32, i32
  }
  func.func @transform_6(%arg0: i32) -> (i32, i32) {
    %c0_i32 = arith.constant 0 : i32
    %c0_i32_0 = arith.constant 0 : i32
    %c0_i32_1 = arith.constant 0 : i32
    return %c0_i32, %c0_i32_0 : i32, i32
  }
  func.func @transform_7(%arg0: i32) -> (i32, i32) {
    %c0_i32 = arith.constant 0 : i32
    %c0_i32_0 = arith.constant 0 : i32
    return %arg0, %c0_i32 : i32, i32
  }
}

</mosaic_0001>

<bundles_post_ra>
// kernel: squeeze.1
= control target key start
LH: loop header
LB: loop body
LE: loop exit
PB: predicated region body
PF: predicated region fallthrough
CT: control target
= control target key end

     0   :  { %s124_s12 = smov 3  ;;  %s138_s13 = smov 3  ;;  %vm107_vm0 = vcmask 64512   ;;  %vm99_vm1 = vcmask 80896   ;;  %vm111_vm2 = vcmask 15360   ;;  %vm114_vm3 = vcmask 1048512   ;;  %s352_s0 = inlined_call_operand.vmem [shape: bf16[2,1,20,10,1], index: 0, kind: input, shape index: {}]   ;;  %s353_s1 = inlined_call_operand.vmem [shape: bf16[2,200], index: 1, kind: output, shape index: {}]  }
   0x1   :  { %v285_v0 = vld [vmem:[%s352_s0 + $0x10] sm:$0xff]   ;;  %v282_v1 = vld [vmem:[%s352_s0] sm:$0xff]   ;;  %v286_v2 = vld [vmem:[%s352_s0 + $0x8] sm:$0xff]   ;;  %s117_s0 = smov 3  ;;  %s131_s14 = smov 3  ;;  %vm121_vm4 = vcmask 982896  }
   0x2   :  { %v275_v3 = vunpack.c.l.bf16 %v285_v0  ;;  %v284_v4 = vunpack.c.h.bf16 %v282_v1  ;;  %v276_v5 = vunpack.c.h.bf16 %v285_v0  ;;  %v279_v6 = vunpack.c.l.bf16 %v286_v2  ;;  %s307_s15 = smov 110   ;;  %s308_s16 = smov 100  }
   0x3   :  { %v280_v7 = vunpack.c.h.bf16 %v286_v2  ;;  %v283_v8 = vunpack.c.l.bf16 %v282_v1  ;;  %s152_s17 = smov 3  ;;  %s145_s18 = smov 3  ;;  %vm156_vm5 = vcmask 589296   ;;  %vm128_vm6 = vcmask 900896  }
   0x4   :  { %36 = vst [vmem:[#allocation1 + $0x20] sm:$0xff] %v275_v3  ;;  %83 = vst [vmem:[#allocation1 + $0x8] sm:$0xff] %v284_v4  ;;  %s102_s19 = smov 3  ;;  %s105_s20 = smov 3  ;;  %vm135_vm7 = vcmask 818896   ;;  %vm142_vm8 = vcmask 736896  }
   0x5   :  { %20 = vst [vmem:[#allocation1 + $0x28] sm:$0xff] %v276_v5  ;;  %68 = vst [vmem:[#allocation1 + $0x10] sm:$0xff] %v279_v6  ;;  %s309_s21 = smov 80   ;;  %s310_s22 = smov 90   ;;  %vm171_vm9 = vcmask 507296   ;;  %vm149_vm10 = vcmask 654896  }
   0x6   :  { %52 = vst [vmem:[#allocation1 + $0x18] sm:$0xff] %v280_v7  ;;  %96 = vst [vmem:[#allocation1] sm:$0xff] %v283_v8  ;;  %s160_s23 = smov 3  ;;  %s311_s24 = smov 62   ;;  %vm164_vm11 = vcmask 572896   ;;  %vm179_vm12 = vcmask 490896  }
   0x7   :  { %s312_s25 = smov 70   ;;  %s167_s26 = smov 3  ;;  %vm186_vm13 = vcmask 425296   ;;  %vm194_vm14 = vcmask 408896   ;;  %vm201_vm15 = vcmask 343296   ;;  %v326_v51 = vmov 0.0  }
   0x8   :  { %s175_s27 = smov 3  ;;  %s97_s28 = smov 3 }
   0x9   :  { %s313_s29 = smov 120   ;;  %s314_s30 = smov 60  }
   0xa   :  { %s182_s2 = smov 3  ;;  %s190_s3 = smov 3 }
   0xb   :  { %v118_v9 = vld [vmem:[#allocation1 + $0xb] ss:$24 sm:%s117_s0]   ;;  %v125_v10 = vld [vmem:[#allocation1 + $0xa] ss:$24 sm:%s124_s12]   ;;  %v139_v11 = vld [vmem:[#allocation1 + $0x8] ss:$24 sm:%s138_s13]  }
   0xc   :  { %119 = vrot.lane.b32.xlu0 %v118_v9, %s307_s15  ;;  %126 = vrot.lane.b32.xlu1 %v125_v10, %s308_s16  ;;  %v132_v12 = vld [vmem:[#allocation1 + $0x9] ss:$24 sm:%s131_s14]   ;;  %v153_v13 = vld [vmem:[#allocation1 + $0x13] ss:$24 sm:%s152_s17]   ;;  %s315_s4 = smov 52   ;;  %s316_s5 = smov 50  }
   0xd   :  { %v146_v14 = vld [vmem:[#allocation1 + $0x7] ss:$24 sm:%s145_s18]   ;;  %v103_v15 = vld [vmem:[#allocation1 + $0xc] ss:$24 sm:%s102_s19]   ;;  %v161_v18 = vld [vmem:[#allocation1 + $0x6] ss:$24 sm:%s160_s23]  }
   0xe   :  { %v106_v16 = vld [vmem:[#allocation1 + $0xc] ss:$24 sm:%s105_s20]   ;;  %v98_v19 = vld [vmem:[#allocation1] ss:$24 sm:%s97_s28]   ;;  %v168_v20 = vld [vmem:[#allocation1 + $0x12] ss:$24 sm:%s167_s26]  }
   0xf   :  { %v108_v17 = vsel %vm107_vm0, %v106_v16, %v103_v15  ;;  %v176_v21 = vld [vmem:[#allocation1 + $0x5] ss:$24 sm:%s175_s27]   ;;  %100 = vst.msk [vmem:[#allocation0] sm:$0x3] %vm99_vm1, %v98_v19   ;;  %v183_v22 = vld [vmem:[#allocation1 + $0x11] ss:$24 sm:%s182_s2]  }
  0x10   :  { %140 = vrot.lane.b32.xlu0 %v139_v11, %s309_s21  ;;  %133 = vrot.lane.b32.xlu1 %v132_v12, %s310_s22  ;;  %v191_v23 = vld [vmem:[#allocation1 + $0x4] ss:$24 sm:%s190_s3]   ;;  %s197_s6 = smov 3  ;;  %s205_s7 = smov 3  ;;  %vm209_vm0 = vcmask 326896   ;;  %vm216_vm1 = vcmask 261296  }
  0x11   :  { %s317_s8 = smov 42   ;;  %s318_s9 = smov 40   ;;  %v198_v24 = vld [vmem:[#allocation1 + $0x10] ss:$24 sm:%s197_s6]   ;;  %v206_v25 = vld [vmem:[#allocation1 + $0x3] ss:$24 sm:%s205_s7]  }
  0x12   :  { %s212_s10 = smov 3  ;;  %s220_s11 = smov 3 }
  0x13   :  { %s319_s0 = smov 32   ;;  %s320_s12 = smov 30   ;;  %v213_v26 = vld [vmem:[#allocation1 + $0xf] ss:$24 sm:%s212_s10]   ;;  %v221_v27 = vld [vmem:[#allocation1 + $0x2] ss:$24 sm:%s220_s11]  }
  0x14   :  { %154 = vrot.lane.b32.xlu0 %v153_v13, %s311_s24  ;;  %147 = vrot.lane.b32.xlu1 %v146_v14, %s312_s25  ;;  %s227_s13 = smov 3  ;;  %s235_s14 = smov 3 }
  0x15   :  { %s321_s15 = smov 22   ;;  %s322_s16 = smov 20   ;;  %v228_v28 = vld [vmem:[#allocation1 + $0xe] ss:$24 sm:%s227_s13]   ;;  %v236_v29 = vld [vmem:[#allocation1 + $0x1] ss:$24 sm:%s235_s14]  }
  0x16   :  { %s242_s17 = smov 3  ;;  %s323_s18 = smov 12  }
  0x17   :  { %s324_s19 = smov 10   ;;  %v243_v30 = vld [vmem:[#allocation1 + $0xd] ss:$24 sm:%s242_s17]   ;;  %s325_s20 = smov 2  }
  0x18   :  { %109 = vrot.lane.b32.xlu0 %v108_v17, %s313_s29  ;;  %162 = vrot.lane.b32.xlu1 %v161_v18, %s314_s30 }
  0x1c   :  { %169 = vrot.lane.b32.xlu0 %v168_v20, %s315_s4  ;;  %177 = vrot.lane.b32.xlu1 %v176_v21, %s316_s5 }
  0x20   :  { %184 = vrot.lane.b32.xlu0 %v183_v22, %s317_s8  ;;  %192 = vrot.lane.b32.xlu1 %v191_v23, %s318_s9 }
  0x24   :  { %199 = vrot.lane.b32.xlu0 %v198_v24, %s319_s0  ;;  %207 = vrot.lane.b32.xlu1 %v206_v25, %s320_s12 }
  0x28   :  { %214 = vrot.lane.b32.xlu0 %v213_v26, %s321_s15  ;;  %222 = vrot.lane.b32.xlu1 %v221_v27, %s322_s16 }
  0x2c   :  { %229 = vrot.lane.b32.xlu0 %v228_v28, %s323_s18  ;;  %237 = vrot.lane.b32.xlu1 %v236_v29, %s324_s19 }
  0x30   :  { %244 = vrot.lane.b32.xlu0 %v243_v30, %s325_s20 }
  0x7e   :  { %v120_v31 = vpop.permute.xlu0 %119   ;;  %v127_v32 = vpop.permute.xlu1 %126  }
  0x82   :  { %v141_v33 = vpop.permute.xlu0 %140   ;;  %v134_v34 = vpop.permute.xlu1 %133  }
  0x86   :  { %v155_v35 = vpop.permute.xlu0 %154   ;;  %v148_v36 = vpop.permute.xlu1 %147  }
  0x8a   :  { %v110_v37 = vpop.permute.xlu0 %109   ;;  %v163_v38 = vpop.permute.xlu1 %162  }
  0x8b   :  { %113 = vst.msk [vmem:[#allocation0 + $0x8] sm:$0x3] %vm111_vm2, %v110_v37   ;;  %vm224_vm2 = vcmask 244896  }
  0x8c   :  { %115 = vst.msk [vmem:[#allocation0] sm:$0x3] %vm114_vm3, %v110_v37   ;;  %vm231_vm3 = vcmask 179296  }
  0x8d   :  { %122 = vst.msk [vmem:[#allocation0] sm:$0x3] %vm121_vm4, %v120_v31   ;;  %vm239_vm4 = vcmask 162896  }
  0x8e   :  { %158 = vst.msk [vmem:[#allocation0 + $0x8] sm:$0x3] %vm156_vm5, %v155_v35   ;;  %v170_v39 = vpop.permute.xlu0 %169   ;;  %v178_v40 = vpop.permute.xlu1 %177   ;;  %vm246_vm5 = vcmask 97296  }
  0x8f   :  { %129 = vst.msk [vmem:[#allocation0] sm:$0x3] %vm128_vm6, %v127_v32  }
  0x90   :  { %136 = vst.msk [vmem:[#allocation0] sm:$0x3] %vm135_vm7, %v134_v34  }
  0x91   :  { %143 = vst.msk [vmem:[#allocation0] sm:$0x3] %vm142_vm8, %v141_v33  }
  0x92   :  { %173 = vst.msk [vmem:[#allocation0 + $0x8] sm:$0x3] %vm171_vm9, %v170_v39   ;;  %v185_v41 = vpop.permute.xlu0 %184   ;;  %v193_v42 = vpop.permute.xlu1 %192  }
  0x93   :  { %150 = vst.msk [vmem:[#allocation0] sm:$0x3] %vm149_vm10, %v148_v36  }
  0x94   :  { %165 = vst.msk [vmem:[#allocation0] sm:$0x3] %vm164_vm11, %v163_v38  }
  0x95   :  { %180 = vst.msk [vmem:[#allocation0] sm:$0x3] %vm179_vm12, %v178_v40  }
  0x96   :  { %188 = vst.msk [vmem:[#allocation0 + $0x8] sm:$0x3] %vm186_vm13, %v185_v41   ;;  %v200_v43 = vpop.permute.xlu0 %199   ;;  %v208_v44 = vpop.permute.xlu1 %207  }
  0x97   :  { %195 = vst.msk [vmem:[#allocation0] sm:$0x3] %vm194_vm14, %v193_v42  }
  0x98   :  { %203 = vst.msk [vmem:[#allocation0 + $0x8] sm:$0x3] %vm201_vm15, %v200_v43  }
  0x99   :  { %210 = vst.msk [vmem:[#allocation0] sm:$0x3] %vm209_vm0, %v208_v44  }
  0x9a   :  { %v215_v45 = vpop.permute.xlu0 %214   ;;  %v223_v46 = vpop.permute.xlu1 %222  }
  0x9b   :  { %218 = vst.msk [vmem:[#allocation0 + $0x8] sm:$0x3] %vm216_vm1, %v215_v45  }
  0x9c   :  { %225 = vst.msk [vmem:[#allocation0] sm:$0x3] %vm224_vm2, %v223_v46  }
  0x9e   :  { %v230_v47 = vpop.permute.xlu0 %229   ;;  %v238_v48 = vpop.permute.xlu1 %237  }
  0x9f   :  { %233 = vst.msk [vmem:[#allocation0 + $0x8] sm:$0x3] %vm231_vm3, %v230_v47  }
  0xa0   :  { %240 = vst.msk [vmem:[#allocation0] sm:$0x3] %vm239_vm4, %v238_v48  }
  0xa2   :  { %v245_v49 = vpop.permute.xlu0 %244  }
  0xa3   :  { %248 = vst.msk [vmem:[#allocation0 + $0x8] sm:$0x3] %vm246_vm5, %v245_v49  }
  0xa7   :  { %v253_v50 = vld [vmem:[#allocation0] sm:$0x3] }
  0xa8   :  { %v254_v52 = vpack.c.bf16 %v326_v51, %v253_v50 }
  0xaa   :  { %256 = vst [vmem:[%s353_s1] sm:$0x1] %v254_v52  ;;  %v258_v53 = vld [vmem:[#allocation0 + $0x8] sm:$0x3] }
  0xab   :  { %v259_v54 = vpack.c.bf16 %v326_v51, %v258_v53 }
  0xad   :  { %272 = vst [vmem:[%s353_s1 + $0x1] sm:$0x1] %v259_v54 }

// kernel: _lambda_.2
= control target key start
LH: loop header
LB: loop body
LE: loop exit
PB: predicated region body
PF: predicated region fallthrough
CT: control target
= control target key end

     0   :  { %s1609_s0 = inlined_call_operand.hbm [shape: bf16[256,512], index: 0, kind: input, shape index: {}]   ;;  %s1610_s1 = inlined_call_operand.hbm [shape: bf16[512,384], index: 1, kind: input, shape index: {}]   ;;  %s1611_s2 = inlined_call_operand.hbm [shape: bf16[384,128], index: 2, kind: input, shape index: {}]   ;;  %s1612_s3 = inlined_call_operand.hbm [shape: bf16[128,128], index: 3, kind: input, shape index: {}]   ;;  %s1613_s4 = inlined_call_operand.vmem [shape: bf16[128,128], index: 4, kind: input, shape index: {}]   ;;  %s1614_s5 = inlined_call_operand.vmem [shape: bf16[128,8], index: 5, kind: input, shape index: {}]   ;;  %s1615_s6 = inlined_call_operand.vmem [shape: bf16[2,1], index: 6, kind: input, shape index: {}]   ;;  %s1616_s7 = inlined_call_operand.<no memory space> [shape: bf16[], index: 7, kind: input, shape index: {}]   ;;  %s1617_s8 = inlined_call_operand.<no memory space> [shape: s32[], index: 8, kind: input, shape index: {}]   ;;  %s1618_s9 = inlined_call_operand.<no memory space> [shape: s32[], index: 9, kind: input, shape index: {}]   ;;  %s1619_s10 = inlined_call_operand.vmem [shape: bf16[2,200], index: 10, kind: input, shape index: {}]   ;;  %s1620_s11 = inlined_call_operand.<no memory space> [shape: bf16[], index: 11, kind: input, shape index: {}]   ;;  %s1621_s12 = inlined_call_operand.vmem [shape: f32[8,8], index: 12, kind: output, shape index: {}]  }
   0x1   :  { %v17_v0 = vstv %s1616_s7  ;;  %v22_v1 = vstv %s1617_s8  ;;  %v23_v2 = vstv %s1618_s9  ;;  %v29_v3 = vstv %s1620_s11 }
   0x2   :  { %v1362_v4 = vunpack.i.l.bf16 %v17_v0  ;;  %v1364_v5 = vunpack.i.l.bf16 %v29_v3 }
   0x3   :  { %34 = vsyncpa [#allocation13], 0 }
   0x4   :  { %35 = vsyncpa [#allocation15], 0 }
   0x5   :  { %36 = vsyncpa [#allocation18], 0  ;;  %s1272_s7 = smov [#allocation14]   ;;  %s1178_s14 = scalar_lea.hbm %s1610_s1, 12288 }
   0x6   :  { %s67_s29 = sshll.u32 %s1272_s7, 4  ;;  %p1179_p0 = scmp.ne.s32.totalorder %s1610_s1, %s1178_s14  ;;  %s68_s29 = int_to_ptr.vmem [resolvable:$true] %s67_s29 }
   0x7   :  { %p1182_p1 = scmp.lt.u32.totalorder %s1178_s14, %s1610_s1 }
   0x9   :  { %p1184_p2 = pnand %p1182_p1, %p1179_p0 }
   0xb   :  { %1187 = shalt.err (!%p1184_p2)
}
   0xc   :  { %s1188_s18 = scalar_lea.vmem %s68_s29, 12288  ;;  %p1193_p4 = scmp.lt.s32.totalorder %s68_s29, %s68_s29 }
   0xd   :  { %p1189_p3 = scmp.ne.s32.totalorder %s68_s29, %s1188_s18  ;;  %p1194_p5 = scmp.lt.s32.totalorder %s1188_s18, %s1188_s18 }
   0xf   :  { %p1195_p6 = por %p1194_p5, %p1193_p4 }
  0x11   :  { %p1196_p7 = pnand %p1195_p6, %p1189_p3 }
  0x13   :  { %1199 = shalt.err (!%p1196_p7)
}
  0x14   :  { %s1273_s19 = smov 384   ;;  %s1274_s20 = smov 24  }
  0x15   :  { %73 = dma.hbm_to_vmem [thread:$0]  %s1610_s1, 12288, %s68_s29, [#allocation15], %s1273_s19, %s1273_s19, %s1274_s20  }
  0x16   :  { %s1275_s23 = smov [#allocation12]   ;;  %s1200_s27 = scalar_lea.hbm %s1609_s0, 8192 }
  0x17   :  { %s55_s24 = sshll.u32 %s1275_s23, 4  ;;  %p1201_p8 = scmp.ne.s32.totalorder %s1609_s0, %s1200_s27  ;;  %s56_s24 = int_to_ptr.vmem [resolvable:$true] %s55_s24 }
  0x18   :  { %p1204_p9 = scmp.lt.u32.totalorder %s1200_s27, %s1609_s0 }
  0x1a   :  { %p1206_p10 = pnand %p1204_p9, %p1201_p8 }
  0x1c   :  { %1209 = shalt.err (!%p1206_p10)
}
  0x1d   :  { %s1210_s14 = scalar_lea.vmem %s56_s24, 8192  ;;  %p1215_p12 = scmp.lt.s32.totalorder %s56_s24, %s56_s24 }
  0x1e   :  { %p1211_p11 = scmp.ne.s32.totalorder %s56_s24, %s1210_s14  ;;  %p1216_p13 = scmp.lt.s32.totalorder %s1210_s14, %s1210_s14 }
  0x20   :  { %p1217_p0 = por %p1216_p13, %p1215_p12 }
  0x22   :  { %p1218_p1 = pnand %p1217_p0, %p1211_p11 }
  0x24   :  { %1221 = shalt.err (!%p1218_p1)
}
  0x25   :  { %s1276_s1 = smov 512   ;;  %s1277_s29 = smov 32  }
  0x26   :  { %61 = dma.hbm_to_vmem [thread:$0]  %s1609_s0, 8192, %s56_s24, [#allocation13], %s1276_s1, %s1276_s1, %s1277_s29  }
  0x27   :  { %s1278_s17 = smov [#allocation16]   ;;  %s1222_s20 = scalar_lea.hbm %s1611_s2, 3072 }
  0x28   :  { %s79_s11 = sshll.u32 %s1278_s17, 4  ;;  %p1223_p2 = scmp.ne.s32.totalorder %s1611_s2, %s1222_s20  ;;  %s80_s11 = int_to_ptr.vmem [resolvable:$true] %s79_s11 }
  0x29   :  { %p1226_p3 = scmp.lt.u32.totalorder %s1222_s20, %s1611_s2 }
  0x2b   :  { %p1228_p4 = pnand %p1226_p3, %p1223_p2 }
  0x2d   :  { %1231 = shalt.err (!%p1228_p4)
}
  0x2e   :  { %s1232_s26 = scalar_lea.vmem %s80_s11, 3072  ;;  %p1237_p6 = scmp.lt.s32.totalorder %s80_s11, %s80_s11 }
  0x2f   :  { %p1233_p5 = scmp.ne.s32.totalorder %s80_s11, %s1232_s26  ;;  %p1238_p7 = scmp.lt.s32.totalorder %s1232_s26, %s1232_s26 }
  0x31   :  { %p1239_p8 = por %p1238_p7, %p1237_p6 }
  0x33   :  { %p1240_p9 = pnand %p1239_p8, %p1233_p5 }
  0x35   :  { %1243 = shalt.err (!%p1240_p9)
}
  0x36   :  { %s1279_s0 = smov 128   ;;  %s1280_s24 = smov 8  }
  0x37   :  { %85 = dma.hbm_to_vmem [thread:$0]  %s1611_s2, 3072, %s80_s11, [#allocation15], %s1279_s0, %s1279_s0, %s1280_s24  }
  0x38   :  { %s1281_s7 = smov [#allocation17]   ;;  %s1244_s1 = scalar_lea.hbm %s1612_s3, 1024 }
  0x39   :  { %s91_s30 = sshll.u32 %s1281_s7, 4  ;;  %p1245_p10 = scmp.ne.s32.totalorder %s1612_s3, %s1244_s1  ;;  %s92_s30 = int_to_ptr.vmem [resolvable:$true] %s91_s30 }
  0x3a   :  { %p1248_p11 = scmp.lt.u32.totalorder %s1244_s1, %s1612_s3 }
  0x3c   :  { %p1250_p12 = pnand %p1248_p11, %p1245_p10 }
  0x3e   :  { %1253 = shalt.err (!%p1250_p12)
}
  0x3f   :  { %s1254_s18 = scalar_lea.vmem %s92_s30, 1024  ;;  %p1259_p0 = scmp.lt.s32.totalorder %s92_s30, %s92_s30 }
  0x40   :  { %p1255_p13 = scmp.ne.s32.totalorder %s92_s30, %s1254_s18  ;;  %p1260_p1 = scmp.lt.s32.totalorder %s1254_s18, %s1254_s18 }
  0x42   :  { %p1261_p2 = por %p1260_p1, %p1259_p0 }
  0x44   :  { %p1262_p3 = pnand %p1261_p2, %p1255_p13 }
  0x46   :  { %1265 = shalt.err (!%p1262_p3)
}
  0x47   :  { %97 = dma.hbm_to_vmem [thread:$0]  %s1612_s3, 1024, %s92_s30, [#allocation18], %s1279_s0, %s1279_s0, %s1280_s24  }
  0x48   :  { %1266 = dma.done.wait [#allocation13], 8192  }
  0x49   :  { %1267 = vsyncadd [#allocation13], 4294959104 }
  0x4a   :  { %1268 = dma.done.wait [#allocation15], 15360  }
  0x4b   :  { %1269 = vsyncadd [#allocation15], 4294951936 }
  0x4c   :  { %1270 = dma.done.wait [#allocation18], 1024  }
  0x4d   :  { %1271 = vsyncadd [#allocation18], 4294966272  ;;  %v145_v6 = vlaneseq  ;;  %v136_v12 = vld [vmem:[%s1615_s6] sm:$0x1]  ;;  %v280_v15 = vld [vmem:[#allocation12 + $0x8] sm:$0xff]  ;;  %s1282_s6 = smov 72  }
  0x4e   :  { %v142_v13 = vld [vmem:[%s1619_s10] sm:$0x1]  ;;  %v137_v16 = vunpack.c.l.bf16 %v136_v12  ;;  %350 = vmatprep.subr.bf16.mxu0 %v280_v15  ;;  %v282_v18 = vld [vmem:[#allocation12 + $0x18] sm:$0xff]  ;;  %v281_v20 = vld [vmem:[#allocation12 + $0x10] sm:$0xff]  ;;  %v1283_v36 = vmov 0.0   ;;  %vm1284_vm9 = vmmov 0  }
  0x4f   :  { %v1414_v7 = vshrl.u32 %v145_v6, 7  ;;  %v165_v8 = vand.u32 127, %v145_v6  ;;  %v143_v17 = vunpack.c.l.bf16 %v142_v13  ;;  %v279_v19 = vld [vmem:[#allocation12] sm:$0xff]  ;;  %391 = vmatprep.subr.bf16.mxu1 %v282_v18  ;;  %v284_v21 = vld [vmem:[#allocation12 + $0x28] sm:$0xff]  ;;  %v286_v22 = vld [vmem:[#allocation12 + $0x38] sm:$0xff]  ;;  %vm958_vm10 = vcmask 64512  }
  0x50   :  { %351 = vmatpush1.bf16.msra.mxu0 %v279_v19  ;;  %392 = vmatpush1.bf16.msra.mxu1 %v281_v20  ;;  %v283_v26 = vld [vmem:[#allocation12 + $0x20] sm:$0xff]  ;;  %v285_v29 = vld [vmem:[#allocation12 + $0x30] sm:$0xff]  ;;  %v288_v30 = vld [vmem:[#allocation12 + $0x48] sm:$0xff] }
  0x51   :  { %vm1421_vm0 = vcmp.lt.s32.totalorder %v1414_v7, %v23_v2  ;;  %vm1429_vm1 = vcmp.lt.s32.totalorder %v165_v8, %v22_v1  ;;  %v206_v11 = vadd.s32 256, %v165_v8  ;;  %vm148_vm3 = vcmp.lt.s32.totalorder %v1414_v7, 2  ;;  %352 = vmatprep.subr.bf16.mxu0 %v284_v21  ;;  %393 = vmatprep.subr.bf16.mxu1 %v286_v22  ;;  %v290_v33 = vld [vmem:[#allocation12 + $0x58] sm:$0xff]  ;;  %v287_v35 = vld [vmem:[#allocation12 + $0x40] sm:$0xff]  ;;  %v289_v38 = vld [vmem:[#allocation12 + $0x50] sm:$0xff] }
  0x52   :  { %vm970_vm2 = vmand %vm1421_vm0, %vm1429_vm1  ;;  %v185_v14 = vsel %vm1421_vm0, %v1362_v4, %v1364_v5  ;;  %vm211_vm5 = vcmp.lt.s32.totalorder %v165_v8, 56  ;;  %v149_v23 = vsel %vm148_vm3, %v143_v17, %v1362_v4  ;;  %v203_v25 = vsel %vm148_vm3, %v137_v16, %v1362_v4  ;;  %v292_v39 = vld [vmem:[#allocation12 + $0x68] sm:$0xff]  ;;  %v294_v40 = vld [vmem:[#allocation12 + $0x78] sm:$0xff] }
  0x53   :  { %vm207_vm4 = vcmp.lt.s32.totalorder %v206_v11, 257  ;;  %v190_v24 = vsel %vm970_vm2, %v185_v14, %v1364_v5  ;;  %v176_v27 = vsel %vm1421_vm0, %v149_v23, %v1364_v5  ;;  %v291_v41 = vld [vmem:[#allocation12 + $0x60] sm:$0xff]  ;;  %v293_v42 = vld [vmem:[#allocation12 + $0x70] sm:$0xff]  ;;  %v296_v43 = vld [vmem:[#allocation12 + $0x88] sm:$0xff]  ;;  %v229_v44 = vadd.s32 128, %v165_v8 }
  0x54   :  { %v208_v28 = vsel %vm207_vm4, %v203_v25, %v1362_v4  ;;  %v181_v31 = vsel %vm970_vm2, %v176_v27, %v1364_v5  ;;  %353 = vmatpush1.bf16.msra.mxu0 %v283_v26  ;;  %394 = vmatpush1.bf16.msra.mxu1 %v285_v29  ;;  %v298_v45 = vld [vmem:[#allocation12 + $0x98] sm:$0xff]  ;;  %v295_v46 = vld [vmem:[#allocation12 + $0x80] sm:$0xff]  ;;  %v297_v47 = vld [vmem:[#allocation12 + $0x90] sm:$0xff] }
  0x55   :  { %v212_v32 = vsel %vm211_vm5, %v208_v28, %v1362_v4  ;;  %v194_v34 = vmax.f32 %v181_v31, %v190_v24  ;;  %354 = vmatprep.subr.bf16.mxu0 %v288_v30  ;;  %395 = vmatprep.subr.bf16.mxu1 %v290_v33  ;;  %v300_v48 = vld [vmem:[#allocation12 + $0xa8] sm:$0xff]  ;;  %v972_v49 = vld [vmem:[%s1619_s10 + $0x1] sm:$0x1]  ;;  %vm1481_vm6 = vcmp.lt.s32.totalorder %v229_v44, %v22_v1  ;;  %v302_v51 = vld [vmem:[#allocation12 + $0xb8] sm:$0xff]  ;;  %vm230_vm7 = vcmp.lt.s32.totalorder %v229_v44, 200 }
  0x56   :  { %213 = vrot.lane.b32.xlu0 %v212_v32, %s1282_s6  ;;  %v220_v52 = vunpack.c.l.bf16 %v972_v49  ;;  %v299_v53 = vld [vmem:[#allocation12 + $0xa0] sm:$0xff]  ;;  %vm973_vm8 = vmand %vm1421_vm0, %vm1481_vm6  ;;  %v301_v55 = vld [vmem:[#allocation12 + $0xb0] sm:$0xff] }
  0x57   :  { %v196_v37 = vpack.c.bf16 %v1283_v36, %v194_v34  ;;  %v304_v56 = vld [vmem:[#allocation12 + $0xc8] sm:$0xff]  ;;  %v306_v58 = vld [vmem:[#allocation12 + $0xd8] sm:$0xff]  ;;  %v303_v61 = vld [vmem:[#allocation12 + $0xc0] sm:$0xff] }
  0x58   :  { %355 = vmatpush1.bf16.msra.mxu0 %v287_v35  ;;  %396 = vmatpush1.bf16.msra.mxu1 %v289_v38  ;;  %v226_v54 = vsel %vm148_vm3, %v220_v52, %v1362_v4  ;;  %v305_v62 = vld [vmem:[#allocation12 + $0xd0] sm:$0xff]  ;;  %v308_v63 = vld [vmem:[#allocation12 + $0xe8] sm:$0xff]  ;;  %v310_v0 = vld [vmem:[#allocation12 + $0xf8] sm:$0xff] }
  0x59   :  { %198 = vst [vmem:[#allocation19] sm:$0xf] %v196_v37  ;;  %356 = vmatprep.subr.bf16.mxu0 %v292_v39  ;;  %397 = vmatprep.subr.bf16.mxu1 %v294_v40  ;;  %v231_v57 = vsel %vm230_vm7, %v226_v54, %v1362_v4  ;;  %v307_v1 = vld [vmem:[#allocation12 + $0xe0] sm:$0xff]  ;;  %v309_v2 = vld [vmem:[#allocation12 + $0xf0] sm:$0xff]  ;;  %v312_v3 = vld [vmem:[#allocation12 + $0x108] sm:$0xff] }
  0x5a   :  { %v253_v59 = vsel %vm1421_vm0, %v231_v57, %v1364_v5  ;;  %v314_v4 = vld [vmem:[#allocation12 + $0x118] sm:$0xff]  ;;  %v311_v6 = vld [vmem:[#allocation12 + $0x100] sm:$0xff]  ;;  %v313_v7 = vld [vmem:[#allocation12 + $0x110] sm:$0xff] }
  0x5b   :  { %v1502_v60 = vsel %vm973_vm8, %v253_v59, %v1364_v5  ;;  %v316_v8 = vld [vmem:[#allocation12 + $0x128] sm:$0xff]  ;;  %v318_v10 = vld [vmem:[#allocation12 + $0x138] sm:$0xff]  ;;  %v315_v11 = vld [vmem:[#allocation12 + $0x120] sm:$0xff] }
  0x5c   :  { %357 = vmatpush1.bf16.msra.mxu0 %v291_v41  ;;  %398 = vmatpush1.bf16.msra.mxu1 %v293_v42  ;;  %v317_v12 = vld [vmem:[#allocation12 + $0x130] sm:$0xff]  ;;  %v320_v13 = vld [vmem:[#allocation12 + $0x148] sm:$0xff]  ;;  %v322_v14 = vld [vmem:[#allocation12 + $0x158] sm:$0xff] }
  0x5d   :  { %358 = vmatprep.subr.bf16.mxu0 %v296_v43  ;;  %399 = vmatprep.subr.bf16.mxu1 %v298_v45  ;;  %v319_v15 = vld [vmem:[#allocation12 + $0x140] sm:$0xff]  ;;  %v321_v16 = vld [vmem:[#allocation12 + $0x150] sm:$0xff]  ;;  %v324_v17 = vld [vmem:[#allocation12 + $0x168] sm:$0xff] }
  0x5e   :  { %v326_v18 = vld [vmem:[#allocation12 + $0x178] sm:$0xff]  ;;  %v323_v19 = vld [vmem:[#allocation12 + $0x160] sm:$0xff]  ;;  %v325_v20 = vld [vmem:[#allocation12 + $0x170] sm:$0xff] }
  0x5f   :  { %v328_v21 = vld [vmem:[#allocation12 + $0x188] sm:$0xff]  ;;  %v330_v22 = vld [vmem:[#allocation12 + $0x198] sm:$0xff]  ;;  %v327_v23 = vld [vmem:[#allocation12 + $0x180] sm:$0xff] }
  0x60   :  { %359 = vmatpush1.bf16.msra.mxu0 %v295_v46  ;;  %400 = vmatpush1.bf16.msra.mxu1 %v297_v47  ;;  %v329_v24 = vld [vmem:[#allocation12 + $0x190] sm:$0xff]  ;;  %v332_v25 = vld [vmem:[#allocation12 + $0x1a8] sm:$0xff]  ;;  %v334_v26 = vld [vmem:[#allocation12 + $0x1b8] sm:$0xff] }
  0x61   :  { %360 = vmatprep.subr.bf16.mxu0 %v300_v48  ;;  %401 = vmatprep.subr.bf16.mxu1 %v302_v51  ;;  %v331_v27 = vld [vmem:[#allocation12 + $0x1a0] sm:$0xff]  ;;  %v333_v28 = vld [vmem:[#allocation12 + $0x1b0] sm:$0xff]  ;;  %v336_v29 = vld [vmem:[#allocation12 + $0x1c8] sm:$0xff] }
  0x62   :  { %v338_v30 = vld [vmem:[#allocation12 + $0x1d8] sm:$0xff]  ;;  %v335_v31 = vld [vmem:[#allocation12 + $0x1c0] sm:$0xff]  ;;  %v337_v32 = vld [vmem:[#allocation12 + $0x1d0] sm:$0xff] }
  0x63   :  { %v340_v33 = vld [vmem:[#allocation12 + $0x1e8] sm:$0xff]  ;;  %v342_v34 = vld [vmem:[#allocation12 + $0x1f8] sm:$0xff]  ;;  %v339_v35 = vld [vmem:[#allocation12 + $0x1e0] sm:$0xff] }
  0x64   :  { %361 = vmatpush1.bf16.msra.mxu0 %v299_v53  ;;  %402 = vmatpush1.bf16.msra.mxu1 %v301_v55  ;;  %v341_v37 = vld [vmem:[#allocation12 + $0x1f0] sm:$0xff]  ;;  %v441_v38 = vld [vmem:[#allocation14 + $0x8] sm:$0xff]  ;;  %v440_v48 = vld [vmem:[#allocation14] sm:$0xff] }
  0x65   :  { %362 = vmatprep.subr.bf16.mxu0 %v304_v56  ;;  %403 = vmatprep.subr.bf16.mxu1 %v306_v58  ;;  %v466_v39 = vld [vmem:[#allocation14 + $0xd0] sm:$0xff]  ;;  %v444_v51 = vld [vmem:[#allocation14 + $0x20] sm:$0xff]  ;;  %v469_v52 = vld [vmem:[#allocation14 + $0xe8] sm:$0xff] }
  0x66   :  { %v442_v49 = vld [vmem:[#allocation14 + $0x10] sm:$0xff]  ;;  %v445_v9 = vld [vmem:[#allocation14 + $0x28] sm:$0xff]  ;;  %v447_v50 = vld [vmem:[#allocation14 + $0x38] sm:$0xff] }
  0x67   :  { %v472_v53 = vld [vmem:[#allocation14 + $0x100] sm:$0xff]  ;;  %v446_v54 = vld [vmem:[#allocation14 + $0x30] sm:$0xff]  ;;  %v475_v57 = vld [vmem:[#allocation14 + $0x118] sm:$0xff] }
  0x68   :  { %363 = vmatpush1.bf16.msra.mxu0 %v303_v61  ;;  %404 = vmatpush1.bf16.msra.mxu1 %v305_v62  ;;  %v448_v55 = vld [vmem:[#allocation14 + $0x40] sm:$0xff]  ;;  %v450_v56 = vld [vmem:[#allocation14 + $0x50] sm:$0xff]  ;;  %v449_v58 = vld [vmem:[#allocation14 + $0x48] sm:$0xff] }
  0x69   :  { %364 = vmatprep.subr.bf16.mxu0 %v308_v63  ;;  %405 = vmatprep.subr.bf16.mxu1 %v310_v0  ;;  %v451_v59 = vld [vmem:[#allocation14 + $0x58] sm:$0xff]  ;;  %v478_v61 = vld [vmem:[#allocation14 + $0x130] sm:$0xff]  ;;  %v452_v62 = vld [vmem:[#allocation14 + $0x60] sm:$0xff] }
  0x6a   :  { %v454_v63 = vld [vmem:[#allocation14 + $0x70] sm:$0xff]  ;;  %v456_v0 = vld [vmem:[#allocation14 + $0x80] sm:$0xff] }
  0x6c   :  { %365 = vmatpush1.bf16.msra.mxu0 %v307_v1  ;;  %406 = vmatpush1.bf16.msra.mxu1 %v309_v2  ;;  %v481_v1 = vld [vmem:[#allocation14 + $0x148] sm:$0xff]  ;;  %v455_v2 = vld [vmem:[#allocation14 + $0x78] sm:$0xff] }
  0x6d   :  { %366 = vmatprep.subr.bf16.mxu0 %v312_v3  ;;  %407 = vmatprep.subr.bf16.mxu1 %v314_v4  ;;  %v457_v3 = vld [vmem:[#allocation14 + $0x88] sm:$0xff]  ;;  %v459_v4 = vld [vmem:[#allocation14 + $0x98] sm:$0xff] }
  0x70   :  { %367 = vmatpush1.bf16.msra.mxu0 %v311_v6  ;;  %408 = vmatpush1.bf16.msra.mxu1 %v313_v7  ;;  %v484_v6 = vld [vmem:[#allocation14 + $0x160] sm:$0xff]  ;;  %v458_v7 = vld [vmem:[#allocation14 + $0x90] sm:$0xff] }
  0x71   :  { %368 = vmatprep.subr.bf16.mxu0 %v316_v8  ;;  %409 = vmatprep.subr.bf16.mxu1 %v318_v10  ;;  %v460_v8 = vld [vmem:[#allocation14 + $0xa0] sm:$0xff]  ;;  %v462_v10 = vld [vmem:[#allocation14 + $0xb0] sm:$0xff] }
  0x74   :  { %369 = vmatpush1.bf16.msra.mxu0 %v315_v11  ;;  %410 = vmatpush1.bf16.msra.mxu1 %v317_v12  ;;  %v461_v11 = vld [vmem:[#allocation14 + $0xa8] sm:$0xff] }
  0x75   :  { %370 = vmatprep.subr.bf16.mxu0 %v320_v13  ;;  %411 = vmatprep.subr.bf16.mxu1 %v322_v14  ;;  %v465_v12 = vld [vmem:[#allocation14 + $0xc8] sm:$0xff]  ;;  %v464_v13 = vld [vmem:[#allocation14 + $0xc0] sm:$0xff] }
  0x76   :  { %v468_v14 = vld [vmem:[#allocation14 + $0xe0] sm:$0xff] }
  0x78   :  { %371 = vmatpush1.bf16.msra.mxu0 %v319_v15  ;;  %412 = vmatpush1.bf16.msra.mxu1 %v321_v16  ;;  %v467_v15 = vld [vmem:[#allocation14 + $0xd8] sm:$0xff] }
  0x79   :  { %372 = vmatprep.subr.bf16.mxu0 %v324_v17  ;;  %413 = vmatprep.subr.bf16.mxu1 %v326_v18  ;;  %v471_v16 = vld [vmem:[#allocation14 + $0xf8] sm:$0xff]  ;;  %v470_v17 = vld [vmem:[#allocation14 + $0xf0] sm:$0xff] }
  0x7a   :  { %v474_v18 = vld [vmem:[#allocation14 + $0x110] sm:$0xff] }
  0x7c   :  { %373 = vmatpush1.bf16.msra.mxu0 %v323_v19  ;;  %414 = vmatpush1.bf16.msra.mxu1 %v325_v20  ;;  %v473_v19 = vld [vmem:[#allocation14 + $0x108] sm:$0xff] }
  0x7d   :  { %374 = vmatprep.subr.bf16.mxu0 %v328_v21  ;;  %415 = vmatprep.subr.bf16.mxu1 %v330_v22  ;;  %v477_v20 = vld [vmem:[#allocation14 + $0x128] sm:$0xff]  ;;  %v476_v21 = vld [vmem:[#allocation14 + $0x120] sm:$0xff] }
  0x7e   :  { %v480_v22 = vld [vmem:[#allocation14 + $0x140] sm:$0xff] }
  0x80   :  { %375 = vmatpush1.bf16.msra.mxu0 %v327_v23  ;;  %416 = vmatpush1.bf16.msra.mxu1 %v329_v24  ;;  %v479_v23 = vld [vmem:[#allocation14 + $0x138] sm:$0xff] }
  0x81   :  { %376 = vmatprep.subr.bf16.mxu0 %v332_v25  ;;  %417 = vmatprep.subr.bf16.mxu1 %v334_v26  ;;  %v483_v24 = vld [vmem:[#allocation14 + $0x158] sm:$0xff]  ;;  %v482_v25 = vld [vmem:[#allocation14 + $0x150] sm:$0xff] }
  0x82   :  { %v486_v26 = vld [vmem:[#allocation14 + $0x170] sm:$0xff] }
  0x84   :  { %377 = vmatpush1.bf16.msra.mxu0 %v331_v27  ;;  %418 = vmatpush1.bf16.msra.mxu1 %v333_v28  ;;  %v487_v27 = vld [vmem:[#allocation14 + $0x178] sm:$0xff]  ;;  %v485_v28 = vld [vmem:[#allocation14 + $0x168] sm:$0xff] }
  0x85   :  { %378 = vmatprep.subr.bf16.mxu0 %v336_v29  ;;  %419 = vmatprep.subr.bf16.mxu1 %v338_v30  ;;  %v463_v29 = vld [vmem:[#allocation14 + $0xb8] sm:$0xff]  ;;  %v489_v30 = vld [vmem:[#allocation14 + $0x188] sm:$0xff] }
  0x88   :  { %379 = vmatpush1.bf16.msra.mxu0 %v335_v31  ;;  %420 = vmatpush1.bf16.msra.mxu1 %v337_v32  ;;  %v514_v31 = vld [vmem:[#allocation14 + $0x250] sm:$0xff] }
  0x89   :  { %380 = vmatprep.subr.bf16.mxu0 %v340_v33  ;;  %421 = vmatprep.subr.bf16.mxu1 %v342_v34 }
  0x8c   :  { %381 = vmatpush1.bf16.msra.mxu0 %v339_v35  ;;  %422 = vmatpush1.bf16.msra.mxu1 %v341_v37 }
  0x8d   :  { %536 = vmatprep.subr.bf16.mxu0 %v441_v38  ;;  %977 = vmatprep.subr.bf16.mxu1 %v466_v39 }
  0xc8   :  { %v214_v40 = vpop.permute.xlu0 %213 }
  0xc9   :  { %v262_v41 = vsel %vm1421_vm0, %v214_v40, %v1364_v5 }
  0xca   :  { %v267_v42 = vsel %vm973_vm8, %v262_v41, %v1364_v5  ;;  %v443_v5 = vld [vmem:[#allocation14 + $0x18] sm:$0xff] }
  0xcb   :  { %v271_v43 = vmax.f32 %v1502_v60, %v267_v42  ;;  %v453_v60 = vld [vmem:[#allocation14 + $0x68] sm:$0xff] }
  0xcd   :  { %v274_v44 = vpack.c.bf16 %v1283_v36, %v271_v43 }
  0xcf   :  { %276 = vst [vmem:[#allocation19 + $0x4] sm:$0xf] %v274_v44 }
  0xd6   :  { %v278_v45 = vld [vmem:[#allocation19] sm:$0xff] }
  0xd7   :  { %v975_v46 = vcombine.low %v278_v45, %v278_v45  ;;  %v976_v47 = vcombine.high %v278_v45, %v278_v45 }
  0xd9   :  { %382 = vmatprep.mubr.bf16.mxu0 %v976_v47  ;;  %423 = vmatprep.mubr.bf16.mxu1 %v976_v47  ;;  %v490_v47 = vld [vmem:[#allocation14 + $0x190] sm:$0xff] }
  0xda   :  { %383 = vmatmul.mubr.bf16.vlgmr.msra.gmra.mrb[0].mxu0 %v975_v46  ;;  %424 = vmatmul.mubr.bf16.vlgmr.msra.gmra.mrb[0].mxu1 %v975_v46  ;;  %v488_v46 = vld [vmem:[#allocation14 + $0x180] sm:$0xff] }
  0xdb   :  { %537 = vmatpush1.bf16.msra.mxu0 %v440_v48  ;;  %978 = vmatpush3.bf16.msra.mxu1 %v442_v49  ;;  %v492_v49 = vld [vmem:[#allocation14 + $0x1a0] sm:$0xff] }
  0xdc   :  { %538 = vmatprep.subr.bf16.mxu0 %v444_v51  ;;  %979 = vmatprep.subr.bf16.mxu1 %v469_v52  ;;  %v517_v51 = vld [vmem:[#allocation14 + $0x268] sm:$0xff]  ;;  %v491_v52 = vld [vmem:[#allocation14 + $0x198] sm:$0xff] }
  0xdf   :  { %539 = vmatpush1.bf16.msra.mxu0 %v443_v5  ;;  %980 = vmatpush3.bf16.msra.mxu1 %v445_v9  ;;  %v493_v5 = vld [vmem:[#allocation14 + $0x1a8] sm:$0xff]  ;;  %v495_v9 = vld [vmem:[#allocation14 + $0x1b8] sm:$0xff] }
  0xe0   :  { %540 = vmatprep.subr.bf16.mxu0 %v447_v50  ;;  %981 = vmatprep.subr.bf16.mxu1 %v472_v53  ;;  %v520_v50 = vld [vmem:[#allocation14 + $0x280] sm:$0xff]  ;;  %v494_v53 = vld [vmem:[#allocation14 + $0x1b0] sm:$0xff] }
  0xe3   :  { %541 = vmatpush1.bf16.msra.mxu0 %v446_v54  ;;  %982 = vmatpush3.bf16.msra.mxu1 %v448_v55  ;;  %v496_v54 = vld [vmem:[#allocation14 + $0x1c0] sm:$0xff]  ;;  %v498_v55 = vld [vmem:[#allocation14 + $0x1d0] sm:$0xff] }
  0xe4   :  { %542 = vmatprep.subr.bf16.mxu0 %v450_v56  ;;  %983 = vmatprep.subr.bf16.mxu1 %v475_v57  ;;  %v523_v56 = vld [vmem:[#allocation14 + $0x298] sm:$0xff]  ;;  %v497_v57 = vld [vmem:[#allocation14 + $0x1c8] sm:$0xff] }
  0xe7   :  { %543 = vmatpush1.bf16.msra.mxu0 %v449_v58  ;;  %984 = vmatpush3.bf16.msra.mxu1 %v451_v59  ;;  %v499_v58 = vld [vmem:[#allocation14 + $0x1d8] sm:$0xff]  ;;  %v501_v59 = vld [vmem:[#allocation14 + $0x1e8] sm:$0xff] }
  0xe8   :  { %544 = vmatprep.subr.bf16.mxu0 %v453_v60  ;;  %985 = vmatprep.subr.bf16.mxu1 %v478_v61  ;;  %v526_v60 = vld [vmem:[#allocation14 + $0x2b0] sm:$0xff]  ;;  %v500_v61 = vld [vmem:[#allocation14 + $0x1e0] sm:$0xff] }
  0xeb   :  { %545 = vmatpush1.bf16.msra.mxu0 %v452_v62  ;;  %986 = vmatpush3.bf16.msra.mxu1 %v454_v63  ;;  %v502_v62 = vld [vmem:[#allocation14 + $0x1f0] sm:$0xff]  ;;  %v504_v63 = vld [vmem:[#allocation14 + $0x200] sm:$0xff] }
  0xec   :  { %546 = vmatprep.subr.bf16.mxu0 %v456_v0  ;;  %987 = vmatprep.subr.bf16.mxu1 %v481_v1  ;;  %v529_v0 = vld [vmem:[#allocation14 + $0x2c8] sm:$0xff]  ;;  %v503_v1 = vld [vmem:[#allocation14 + $0x1f8] sm:$0xff] }
  0xef   :  { %547 = vmatpush1.bf16.msra.mxu0 %v455_v2  ;;  %988 = vmatpush3.bf16.msra.mxu1 %v457_v3  ;;  %v505_v2 = vld [vmem:[#allocation14 + $0x208] sm:$0xff]  ;;  %v507_v3 = vld [vmem:[#allocation14 + $0x218] sm:$0xff] }
  0xf0   :  { %548 = vmatprep.subr.bf16.mxu0 %v459_v4  ;;  %989 = vmatprep.subr.bf16.mxu1 %v484_v6  ;;  %v532_v4 = vld [vmem:[#allocation14 + $0x2e0] sm:$0xff]  ;;  %v506_v6 = vld [vmem:[#allocation14 + $0x210] sm:$0xff] }
  0xf3   :  { %549 = vmatpush1.bf16.msra.mxu0 %v458_v7  ;;  %990 = vmatpush3.bf16.msra.mxu1 %v460_v8  ;;  %v508_v7 = vld [vmem:[#allocation14 + $0x220] sm:$0xff]  ;;  %v510_v8 = vld [vmem:[#allocation14 + $0x230] sm:$0xff] }
  0xf4   :  { %550 = vmatprep.subr.bf16.mxu0 %v462_v10  ;;  %991 = vmatprep.subr.bf16.mxu1 %v487_v27  ;;  %v535_v10 = vld [vmem:[#allocation14 + $0x2f8] sm:$0xff] }
  0xf5   :  { %v531_v27 = vld [vmem:[#allocation14 + $0x2d8] sm:$0xff] }
  0xf7   :  { %551 = vmatpush1.bf16.msra.mxu0 %v461_v11  ;;  %992 = vmatpush3.bf16.msra.mxu1 %v463_v29  ;;  %v534_v29 = vld [vmem:[#allocation14 + $0x2f0] sm:$0xff] }
  0xf8   :  { %552 = vmatprep.subr.bf16.mxu0 %v465_v12  ;;  %999 = vmatprep.subr.bf16.mxu1 %v514_v31  ;;  %v509_v12 = vld [vmem:[#allocation14 + $0x228] sm:$0xff]  ;;  %v712_v31 = vld [vmem:[#allocation16 + $0x40] sm:$0xff] }
  0xfb   :  { %553 = vmatpush1.bf16.msra.mxu0 %v464_v13  ;;  %v511_v13 = vld [vmem:[#allocation14 + $0x238] sm:$0xff] }
  0xfc   :  { %554 = vmatprep.subr.bf16.mxu0 %v468_v14  ;;  %v513_v14 = vld [vmem:[#allocation14 + $0x248] sm:$0xff] }
  0xff   :  { %555 = vmatpush1.bf16.msra.mxu0 %v467_v15 }
 0x100   :  { %556 = vmatprep.subr.bf16.mxu0 %v471_v16  ;;  %v512_v16 = vld [vmem:[#allocation14 + $0x240] sm:$0xff] }
 0x103   :  { %557 = vmatpush1.bf16.msra.mxu0 %v470_v17  ;;  %v516_v17 = vld [vmem:[#allocation14 + $0x260] sm:$0xff] }
 0x104   :  { %558 = vmatprep.subr.bf16.mxu0 %v474_v18  ;;  %v515_v18 = vld [vmem:[#allocation14 + $0x258] sm:$0xff] }
 0x107   :  { %559 = vmatpush1.bf16.msra.mxu0 %v473_v19  ;;  %v519_v19 = vld [vmem:[#allocation14 + $0x278] sm:$0xff] }
 0x108   :  { %560 = vmatprep.subr.bf16.mxu0 %v477_v20  ;;  %v518_v20 = vld [vmem:[#allocation14 + $0x270] sm:$0xff] }
 0x10b   :  { %561 = vmatpush1.bf16.msra.mxu0 %v476_v21  ;;  %v522_v21 = vld [vmem:[#allocation14 + $0x290] sm:$0xff] }
 0x10c   :  { %562 = vmatprep.subr.bf16.mxu0 %v480_v22  ;;  %v521_v22 = vld [vmem:[#allocation14 + $0x288] sm:$0xff] }
 0x10f   :  { %563 = vmatpush1.bf16.msra.mxu0 %v479_v23  ;;  %v525_v23 = vld [vmem:[#allocation14 + $0x2a8] sm:$0xff] }
 0x110   :  { %564 = vmatprep.subr.bf16.mxu0 %v483_v24  ;;  %v524_v24 = vld [vmem:[#allocation14 + $0x2a0] sm:$0xff] }
 0x113   :  { %565 = vmatpush1.bf16.msra.mxu0 %v482_v25  ;;  %v528_v25 = vld [vmem:[#allocation14 + $0x2c0] sm:$0xff] }
 0x114   :  { %566 = vmatprep.subr.bf16.mxu0 %v486_v26  ;;  %v527_v26 = vld [vmem:[#allocation14 + $0x2b8] sm:$0xff] }
 0x117   :  { %567 = vmatpush1.bf16.msra.mxu0 %v485_v28  ;;  %v530_v28 = vld [vmem:[#allocation14 + $0x2d0] sm:$0xff] }
 0x118   :  { %577 = vmatprep.subr.bf16.mxu0 %v489_v30  ;;  %v533_v30 = vld [vmem:[#allocation14 + $0x2e8] sm:$0xff] }
 0x1ad   :  { %v384_v32 = vpop.f32.mrb[0].mxu0  ;;  %v1515_v33 = vpop.f32.mrb[0].mxu1 }
 0x1ae   :  { %v432_v34 = vmax.f32 %v384_v32, 0.0  ;;  %v386_v35 = vpop.f32.mrb[1].mxu0  ;;  %v427_v37 = vpop.f32.mrb[1].mxu1  ;;  %v434_v11 = vmax.f32 %v1515_v33, 0.0  ;;  %v704_v32 = vld [vmem:[#allocation16] sm:$0xff]  ;;  %v713_v33 = vld [vmem:[#allocation16 + $0x48] sm:$0xff] }
 0x1af   :  { %v433_v38 = vmax.f32 %v386_v35, 0.0  ;;  %v388_v39 = vpop.f32.mrb[2].mxu0  ;;  %v429_v40 = vpop.f32.mrb[2].mxu1  ;;  %v435_v41 = vmax.f32 %v427_v37, 0.0  ;;  %v714_v35 = vld [vmem:[#allocation16 + $0x50] sm:$0xff] }
 0x1b0   :  { %v389_v42 = vpop.f32.mrb[3].mxu0  ;;  %v430_v43 = vpop.f32.mrb[3].mxu1  ;;  %v436_v45 = vpack.c.bf16 %v432_v34, %v432_v34  ;;  %v438_v15 = vpack.c.bf16 %v434_v11, %v434_v11  ;;  %v705_v34 = vld [vmem:[#allocation16 + $0x8] sm:$0xff]  ;;  %v706_v37 = vld [vmem:[#allocation16 + $0x10] sm:$0xff]  ;;  %v707_v39 = vld [vmem:[#allocation16 + $0x18] sm:$0xff] }
 0x1b1   :  { %v437_v44 = vpack.c.bf16 %v433_v38, %v433_v38  ;;  %v439_v48 = vpack.c.bf16 %v435_v41, %v435_v41  ;;  %v715_v38 = vld [vmem:[#allocation16 + $0x58] sm:$0xff]  ;;  %v716_v40 = vld [vmem:[#allocation16 + $0x60] sm:$0xff]  ;;  %v717_v42 = vld [vmem:[#allocation16 + $0x68] sm:$0xff] }
 0x1b2   :  { %v708_v41 = vld [vmem:[#allocation16 + $0x20] sm:$0xff]  ;;  %v709_v43 = vld [vmem:[#allocation16 + $0x28] sm:$0xff]  ;;  %v727_v11 = vld [vmem:[#allocation16 + $0xb8] sm:$0xff] }
 0x1b3   :  { %568 = vmatprep.mubr.bf16.mxu0 %v437_v44  ;;  %650 = vmatprep.mubr.bf16.mxu1 %v437_v44  ;;  %v718_v44 = vld [vmem:[#allocation16 + $0x70] sm:$0xff] }
 0x1b4   :  { %569 = vmatmul.mubr.bf16.vlgmr.msra.gmra.mrb[4].mxu0 %v436_v45  ;;  %651 = vmatmul.mubr.bf16.vlgmr.msra.gmra.mrb[4].mxu1 %v436_v45  ;;  %v710_v45 = vld [vmem:[#allocation16 + $0x30] sm:$0xff] }
 0x1b5   :  { %578 = vmatpush1.bf16.msra.mxu0 %v488_v46  ;;  %1000 = vmatpush3.bf16.msra.mxu1 %v490_v47  ;;  %v719_v46 = vld [vmem:[#allocation16 + $0x78] sm:$0xff] }
 0x1b6   :  { %609 = vmatprep.mubr.bf16.mxu0 %v439_v48  ;;  %690 = vmatprep.mubr.bf16.mxu1 %v439_v48  ;;  %v711_v47 = vld [vmem:[#allocation16 + $0x38] sm:$0xff] }
 0x1b7   :  { %579 = vmatprep.subr.bf16.mxu0 %v492_v49  ;;  %1001 = vmatprep.subr.bf16.mxu1 %v517_v51 }
 0x1b9   :  { %580 = vmatpush1.bf16.msra.mxu0 %v491_v52  ;;  %1002 = vmatpush3.bf16.msra.mxu1 %v493_v5 }
 0x1ba   :  { %581 = vmatprep.subr.bf16.mxu0 %v495_v9  ;;  %1003 = vmatprep.subr.bf16.mxu1 %v520_v50 }
 0x1bd   :  { %582 = vmatpush1.bf16.msra.mxu0 %v494_v53  ;;  %1004 = vmatpush3.bf16.msra.mxu1 %v496_v54 }
 0x1be   :  { %583 = vmatprep.subr.bf16.mxu0 %v498_v55  ;;  %1005 = vmatprep.subr.bf16.mxu1 %v523_v56 }
 0x1c1   :  { %584 = vmatpush1.bf16.msra.mxu0 %v497_v57  ;;  %1006 = vmatpush3.bf16.msra.mxu1 %v499_v58 }
 0x1c2   :  { %585 = vmatprep.subr.bf16.mxu0 %v501_v59  ;;  %1007 = vmatprep.subr.bf16.mxu1 %v526_v60 }
 0x1c5   :  { %586 = vmatpush1.bf16.msra.mxu0 %v500_v61  ;;  %1008 = vmatpush3.bf16.msra.mxu1 %v502_v62 }
 0x1c6   :  { %587 = vmatprep.subr.bf16.mxu0 %v504_v63  ;;  %1009 = vmatprep.subr.bf16.mxu1 %v529_v0 }
 0x1c9   :  { %588 = vmatpush1.bf16.msra.mxu0 %v503_v1  ;;  %1010 = vmatpush3.bf16.msra.mxu1 %v505_v2  ;;  %v720_v1 = vld [vmem:[#allocation16 + $0x80] sm:$0xff]  ;;  %v721_v2 = vld [vmem:[#allocation16 + $0x88] sm:$0xff] }
 0x1ca   :  { %589 = vmatprep.subr.bf16.mxu0 %v507_v3  ;;  %1011 = vmatprep.subr.bf16.mxu1 %v532_v4  ;;  %v722_v3 = vld [vmem:[#allocation16 + $0x90] sm:$0xff]  ;;  %v723_v4 = vld [vmem:[#allocation16 + $0x98] sm:$0xff] }
 0x1cd   :  { %590 = vmatpush1.bf16.msra.mxu0 %v506_v6  ;;  %1012 = vmatpush3.bf16.msra.mxu1 %v508_v7  ;;  %v724_v6 = vld [vmem:[#allocation16 + $0xa0] sm:$0xff]  ;;  %v725_v7 = vld [vmem:[#allocation16 + $0xa8] sm:$0xff] }
 0x1ce   :  { %591 = vmatprep.subr.bf16.mxu0 %v510_v8  ;;  %1013 = vmatprep.subr.bf16.mxu1 %v535_v10  ;;  %v726_v8 = vld [vmem:[#allocation16 + $0xb0] sm:$0xff] }
 0x1d1   :  { %592 = vmatpush1.bf16.msra.mxu0 %v509_v12  ;;  %1014 = vmatpush3.bf16.msra.mxu1 %v511_v13  ;;  %v810_v13 = vld [vmem:[#allocation17] sm:$0xff] }
 0x1d2   :  { %593 = vmatprep.subr.bf16.mxu0 %v513_v14  ;;  %1021 = vmatprep.subr.bf16.mxu1 %v712_v31  ;;  %v811_v14 = vld [vmem:[#allocation17 + $0x8] sm:$0xff] }
 0x1d4   :  { %691 = vmatmul.mubr.bf16.vlgmr.msra.gmra.mrb[8].mxu1 %v438_v15 }
 0x1d5   :  { %594 = vmatpush1.bf16.msra.mxu0 %v512_v16  ;;  %1022 = vmatpush3.bf16.msra.mxu1 %v704_v32  ;;  %v813_v16 = vld [vmem:[#allocation17 + $0x18] sm:$0xff] }
 0x1d6   :  { %595 = vmatprep.subr.bf16.mxu0 %v516_v17  ;;  %1023 = vmatprep.subr.bf16.mxu1 %v713_v33  ;;  %v814_v17 = vld [vmem:[#allocation17 + $0x20] sm:$0xff] }
 0x1d9   :  { %596 = vmatpush1.bf16.msra.mxu0 %v515_v18  ;;  %1024 = vmatpush3.bf16.msra.mxu1 %v705_v34  ;;  %v815_v18 = vld [vmem:[#allocation17 + $0x28] sm:$0xff] }
 0x1da   :  { %597 = vmatprep.subr.bf16.mxu0 %v519_v19  ;;  %1025 = vmatprep.subr.bf16.mxu1 %v714_v35  ;;  %v816_v19 = vld [vmem:[#allocation17 + $0x30] sm:$0xff] }
 0x1dd   :  { %598 = vmatpush1.bf16.msra.mxu0 %v518_v20  ;;  %1026 = vmatpush3.bf16.msra.mxu1 %v706_v37  ;;  %v817_v20 = vld [vmem:[#allocation17 + $0x38] sm:$0xff] }
 0x1de   :  { %599 = vmatprep.subr.bf16.mxu0 %v522_v21  ;;  %1027 = vmatprep.subr.bf16.mxu1 %v715_v38  ;;  %v860_v21 = vld [vmem:[%s1613_s4] sm:$0xff] }
 0x1e1   :  { %600 = vmatpush1.bf16.msra.mxu0 %v521_v22  ;;  %1028 = vmatpush3.bf16.msra.mxu1 %v707_v39  ;;  %v861_v22 = vld [vmem:[%s1613_s4 + $0x8] sm:$0xff] }
 0x1e2   :  { %601 = vmatprep.subr.bf16.mxu0 %v525_v23  ;;  %1029 = vmatprep.subr.bf16.mxu1 %v716_v40  ;;  %v862_v23 = vld [vmem:[%s1613_s4 + $0x10] sm:$0xff] }
 0x1e5   :  { %602 = vmatpush1.bf16.msra.mxu0 %v524_v24  ;;  %1030 = vmatpush3.bf16.msra.mxu1 %v708_v41  ;;  %v863_v24 = vld [vmem:[%s1613_s4 + $0x18] sm:$0xff] }
 0x1e6   :  { %603 = vmatprep.subr.bf16.mxu0 %v528_v25  ;;  %1031 = vmatprep.subr.bf16.mxu1 %v717_v42  ;;  %v864_v25 = vld [vmem:[%s1613_s4 + $0x20] sm:$0xff]  ;;  %v867_v41 = vld [vmem:[%s1613_s4 + $0x38] sm:$0xff] }
 0x1e7   :  { %v910_v42 = vld [vmem:[%s1614_s5] sm:$0xff] }
 0x1e9   :  { %604 = vmatpush1.bf16.msra.mxu0 %v527_v26  ;;  %1032 = vmatpush3.bf16.msra.mxu1 %v709_v43  ;;  %v865_v26 = vld [vmem:[%s1613_s4 + $0x28] sm:$0xff] }
 0x1ea   :  { %605 = vmatprep.subr.bf16.mxu0 %v531_v27  ;;  %1033 = vmatprep.subr.bf16.mxu1 %v718_v44  ;;  %v866_v27 = vld [vmem:[%s1613_s4 + $0x30] sm:$0xff]  ;;  %v911_v43 = vld [vmem:[%s1614_s5 + $0x8] sm:$0xff] }
 0x1eb   :  { %v912_v44 = vld [vmem:[%s1614_s5 + $0x10] sm:$0xff] }
 0x1ed   :  { %606 = vmatpush1.bf16.msra.mxu0 %v530_v28  ;;  %1034 = vmatpush3.bf16.msra.mxu1 %v710_v45  ;;  %v913_v45 = vld [vmem:[%s1614_s5 + $0x18] sm:$0xff] }
 0x1ee   :  { %607 = vmatprep.subr.bf16.mxu0 %v534_v29  ;;  %1035 = vmatprep.subr.bf16.mxu1 %v719_v46  ;;  %v914_v46 = vld [vmem:[%s1614_s5 + $0x20] sm:$0xff] }
 0x1f1   :  { %608 = vmatpush1.bf16.msra.mxu0 %v533_v30  ;;  %1036 = vmatpush3.bf16.msra.mxu1 %v711_v47  ;;  %v915_v47 = vld [vmem:[%s1614_s5 + $0x28] sm:$0xff] }
 0x1f2   :  { %1099 = vmatprep.subr.bf16.mxu0 %v1283_v36  ;;  %1079 = vmatprep.subr.bf16.mxu1 %v1283_v36 }
 0x1f4   :  { %610 = vmatmul.mubr.bf16.vlgmr.msra.gmra.mrb[4].mxu0 %v438_v15  ;;  %v812_v15 = vld [vmem:[#allocation17 + $0x10] sm:$0xff] }
 0x1f5   :  { %1115 = vmatprep.mubr.msk.bf16.mxu0 %vm1284_vm9, %v1283_v36  ;;  %1100 = vmatpush3.bf16.msra.mxu0 %v810_v13 }
 0x1f6   :  { %1101 = vmatprep.subr.bf16.mxu0 %v1283_v36 }
 0x1f9   :  { %1102 = vmatpush3.bf16.msra.mxu0 %v811_v14 }
 0x1fa   :  { %1103 = vmatprep.subr.bf16.mxu0 %v1283_v36 }
 0x1fd   :  { %1104 = vmatpush3.bf16.msra.mxu0 %v812_v15 }
 0x1fe   :  { %1105 = vmatprep.subr.bf16.mxu0 %v1283_v36 }
 0x201   :  { %1106 = vmatpush3.bf16.msra.mxu0 %v813_v16 }
 0x202   :  { %1107 = vmatprep.subr.bf16.mxu0 %v1283_v36 }
 0x205   :  { %1108 = vmatpush3.bf16.msra.mxu0 %v814_v17 }
 0x206   :  { %1109 = vmatprep.subr.bf16.mxu0 %v1283_v36 }
 0x209   :  { %1110 = vmatpush3.bf16.msra.mxu0 %v815_v18 }
 0x20a   :  { %1111 = vmatprep.subr.bf16.mxu0 %v1283_v36 }
 0x20d   :  { %1112 = vmatpush3.bf16.msra.mxu0 %v816_v19 }
 0x20e   :  { %1113 = vmatprep.subr.bf16.mxu0 %v1283_v36 }
 0x211   :  { %1114 = vmatpush3.bf16.msra.mxu0 %v817_v20 }
 0x212   :  { %1139 = vmatprep.subr.bf16.mxu0 %v1283_v36 }
 0x287   :  { %v993_v48 = vpop.f32.mrb[4].mxu1 }
 0x288   :  { %v994_v49 = vpop.f32.mrb[5].mxu1 }
 0x289   :  { %v995_v51 = vadd.f32 %v994_v49, %v993_v48  ;;  %v996_v52 = vpop.f32.mrb[6].mxu1  ;;  %v916_v48 = vld [vmem:[%s1614_s5 + $0x30] sm:$0xff] }
 0x28a   :  { %v997_v5 = vpop.f32.mrb[7].mxu1 }
 0x2a7   :  { %v1015_v9 = vpop.f32.mrb[8].mxu1 }
 0x2a8   :  { %v1016_v50 = vpop.f32.mrb[9].mxu1 }
 0x2a9   :  { %v1017_v53 = vadd.f32 %v1016_v50, %v1015_v9  ;;  %v1018_v54 = vpop.f32.mrb[10].mxu1 }
 0x2aa   :  { %v1019_v55 = vpop.f32.mrb[11].mxu1 }
 0x2ab   :  { %v693_v56 = vadd.f32 %v1017_v53, %v995_v51  ;;  %v917_v53 = vld [vmem:[%s1614_s5 + $0x38] sm:$0xff] }
 0x2ad   :  { %v700_v10 = vmax.f32 %v693_v56, 0.0 }
 0x2af   :  { %v703_v12 = vpack.c.bf16 %v700_v10, %v700_v10 }
 0x2c7   :  { %v611_v57 = vpop.f32.mrb[4].mxu0 }
 0x2c8   :  { %v698_v58 = vmax.f32 %v611_v57, 0.0  ;;  %v613_v59 = vpop.f32.mrb[5].mxu0 }
 0x2c9   :  { %v699_v60 = vmax.f32 %v613_v59, 0.0  ;;  %v615_v61 = vpop.f32.mrb[6].mxu0 }
 0x2ca   :  { %v616_v62 = vpop.f32.mrb[7].mxu0  ;;  %v701_v0 = vpack.c.bf16 %v698_v58, %v698_v58 }
 0x2cb   :  { %v702_v63 = vpack.c.bf16 %v699_v60, %v699_v60 }
 0x2cd   :  { %760 = vmatprep.mubr.bf16.mxu1 %v702_v63 }
 0x2ce   :  { %761 = vmatmul.mubr.bf16.vlgmr.msra.gmra.mrb[12].mxu1 %v701_v0 }
 0x2cf   :  { %1080 = vmatpush3.bf16.msra.mxu1 %v720_v1  ;;  %1095 = vmatprep.mubr.msk.bf16.mxu1 %vm1284_vm9, %v1283_v36 }
 0x2d0   :  { %1081 = vmatprep.subr.bf16.mxu1 %v1283_v36 }
 0x2d3   :  { %1082 = vmatpush3.bf16.msra.mxu1 %v721_v2 }
 0x2d4   :  { %1083 = vmatprep.subr.bf16.mxu1 %v1283_v36 }
 0x2d7   :  { %1084 = vmatpush3.bf16.msra.mxu1 %v722_v3 }
 0x2d8   :  { %1085 = vmatprep.subr.bf16.mxu1 %v1283_v36 }
 0x2db   :  { %1086 = vmatpush3.bf16.msra.mxu1 %v723_v4 }
 0x2dc   :  { %1087 = vmatprep.subr.bf16.mxu1 %v1283_v36 }
 0x2df   :  { %1088 = vmatpush3.bf16.msra.mxu1 %v724_v6 }
 0x2e0   :  { %1089 = vmatprep.subr.bf16.mxu1 %v1283_v36 }
 0x2e3   :  { %1090 = vmatpush3.bf16.msra.mxu1 %v725_v7 }
 0x2e4   :  { %1091 = vmatprep.subr.bf16.mxu1 %v1283_v36 }
 0x2e7   :  { %1092 = vmatpush3.bf16.msra.mxu1 %v726_v8 }
 0x2e8   :  { %1093 = vmatprep.subr.bf16.mxu1 %v1283_v36 }
 0x2eb   :  { %1094 = vmatpush3.bf16.msra.mxu1 %v727_v11 }
 0x2ec   :  { %1119 = vmatprep.subr.bf16.mxu1 %v1283_v36 }
 0x2ee   :  { %1096 = vmatmul.mubr.bf16.vlgmr.msra.gmra.mrb[16].mxu1 %v703_v12 }
 0x2ef   :  { %1135 = vmatprep.mubr.msk.bf16.mxu1 %vm1284_vm9, %v1283_v36  ;;  %1120 = vmatpush3.bf16.msra.mxu1 %v860_v21 }
 0x2f0   :  { %1121 = vmatprep.subr.bf16.mxu1 %v1283_v36 }
 0x2f3   :  { %1122 = vmatpush3.bf16.msra.mxu1 %v861_v22 }
 0x2f4   :  { %1123 = vmatprep.subr.bf16.mxu1 %v1283_v36 }
 0x2f7   :  { %1124 = vmatpush3.bf16.msra.mxu1 %v862_v23 }
 0x2f8   :  { %1125 = vmatprep.subr.bf16.mxu1 %v1283_v36 }
 0x2fb   :  { %1126 = vmatpush3.bf16.msra.mxu1 %v863_v24 }
 0x2fc   :  { %1127 = vmatprep.subr.bf16.mxu1 %v1283_v36 }
 0x2ff   :  { %1128 = vmatpush3.bf16.msra.mxu1 %v864_v25 }
 0x300   :  { %1129 = vmatprep.subr.bf16.mxu1 %v1283_v36 }
 0x303   :  { %1130 = vmatpush3.bf16.msra.mxu1 %v865_v26 }
 0x304   :  { %1131 = vmatprep.subr.bf16.mxu1 %v1283_v36 }
 0x307   :  { %1132 = vmatpush3.bf16.msra.mxu1 %v866_v27 }
 0x308   :  { %1133 = vmatprep.subr.bf16.mxu1 %v1283_v36 }
 0x30b   :  { %1134 = vmatpush3.bf16.msra.mxu1 %v867_v41 }
 0x3a1   :  { %v1037_v28 = vpop.f32.mrb[12].mxu1 }
 0x3a2   :  { %v1038_v29 = vpop.f32.mrb[13].mxu1 }
 0x3a3   :  { %v1039_v30 = vadd.f32 %v1038_v29, %v1037_v28  ;;  %v1040_v31 = vpop.f32.mrb[14].mxu1 }
 0x3a4   :  { %v1041_v32 = vpop.f32.mrb[15].mxu1 }
 0x3c1   :  { %v802_v33 = vpop.f32.mrb[16].mxu1 }
 0x3c2   :  { %v803_v34 = vadd.f32 %v1039_v30, %v802_v33  ;;  %v1097_v35 = vpop.f32.mrb[17].mxu1 }
 0x3c3   :  { %v805_v37 = vpop.f32.mrb[18].mxu1 }
 0x3c4   :  { %v808_v38 = vmax.f32 %v803_v34, 0.0  ;;  %v1098_v39 = vpop.f32.mrb[19].mxu1 }
 0x3c6   :  { %v809_v40 = vpack.c.bf16 %v808_v38, %v808_v38 }
 0x3c8   :  { %1116 = vmatmul.mubr.bf16.vlgmr.msra.gmra.mrb[8].mxu0 %v809_v40 }
 0x3c9   :  { %1155 = vmatprep.mubr.msk.bf16.mxu0 %vm1284_vm9, %v1283_v36  ;;  %1140 = vmatpush3.bf16.msra.mxu0 %v910_v42 }
 0x3ca   :  { %1141 = vmatprep.subr.bf16.mxu0 %v1283_v36 }
 0x3cd   :  { %1142 = vmatpush3.bf16.msra.mxu0 %v911_v43 }
 0x3ce   :  { %1143 = vmatprep.subr.bf16.mxu0 %v1283_v36 }
 0x3d1   :  { %1144 = vmatpush3.bf16.msra.mxu0 %v912_v44 }
 0x3d2   :  { %1145 = vmatprep.subr.bf16.mxu0 %v1283_v36 }
 0x3d5   :  { %1146 = vmatpush3.bf16.msra.mxu0 %v913_v45 }
 0x3d6   :  { %1147 = vmatprep.subr.bf16.mxu0 %v1283_v36 }
 0x3d9   :  { %1148 = vmatpush3.bf16.msra.mxu0 %v914_v46 }
 0x3da   :  { %1149 = vmatprep.subr.bf16.mxu0 %v1283_v36 }
 0x3dd   :  { %1150 = vmatpush3.bf16.msra.mxu0 %v915_v47 }
 0x3de   :  { %1151 = vmatprep.subr.bf16.mxu0 %v1283_v36 }
 0x3e1   :  { %1152 = vmatpush3.bf16.msra.mxu0 %v916_v48 }
 0x3e2   :  { %1153 = vmatprep.subr.bf16.mxu0 %v1283_v36 }
 0x3e5   :  { %1154 = vmatpush3.bf16.msra.mxu0 %v917_v53 }
 0x49b   :  { %v852_v49 = vpop.f32.mrb[8].mxu0 }
 0x49c   :  { %v858_v51 = vmax.f32 %v852_v49, 0.0  ;;  %v1117_v52 = vpop.f32.mrb[9].mxu0 }
 0x49d   :  { %v855_v5 = vpop.f32.mrb[10].mxu0 }
 0x49e   :  { %v859_v9 = vpack.c.bf16 %v858_v51, %v858_v51  ;;  %v1118_v50 = vpop.f32.mrb[11].mxu0 }
 0x4a0   :  { %1136 = vmatmul.mubr.bf16.vlgmr.msra.gmra.mrb[20].mxu1 %v859_v9 }
 0x573   :  { %v902_v54 = vpop.f32.mrb[20].mxu1 }
 0x574   :  { %v908_v55 = vmax.f32 %v902_v54, 0.0  ;;  %v1137_v56 = vpop.f32.mrb[21].mxu1 }
 0x575   :  { %v905_v57 = vpop.f32.mrb[22].mxu1 }
 0x576   :  { %v909_v58 = vpack.c.bf16 %v908_v55, %v908_v55  ;;  %v1138_v59 = vpop.f32.mrb[23].mxu1 }
 0x578   :  { %1156 = vmatmul.mubr.bf16.vlgmr.msra.gmra.mrb[12].mxu0 %v909_v58 }
 0x64b   :  { %v952_v36 = vpop.f32.mrb[12].mxu0 }
 0x64c   :  { %959 = vst.msk [vmem:[%s1621_s12] sm:$0xff] %vm958_vm10, %v952_v36  ;;  %v1157_v60 = vpop.f32.mrb[13].mxu0 }
 0x64d   :  { %v955_v61 = vpop.f32.mrb[14].mxu0 }
 0x64e   :  { %v1158_v62 = vpop.f32.mrb[15].mxu0 }
 0x64f   :  { %964 = vsyncpa [#allocation13], 1 }
 0x650   :  { %965 = vsyncpa [#allocation15], 1 }
 0x651   :  { %966 = vsyncpa [#allocation18], 1 }

</bundles_post_ra>
